<compile_context>
chip_gen: v5e
topology: v5e:2x2
jax: 0.10.0
libtpu: 0.0.40
codegen_flags: <defaults>
</compile_context>

<pallas_src>
import functools
import math
from collections import namedtuple

import jax
import jax.numpy as jnp
from jax.experimental import pallas as pl
from jax.experimental.pallas import tpu as pltpu


def _round_up(x, m):
    return ((x + m - 1) // m) * m


LayerCfg = namedtuple(
    "LayerCfg",
    "in_features out_features spline_order num_bases0 coeff grid_lo h_step")


# ----------------------------------------------------------------------------
# Fused Pallas kernel: the whole KAN stack applied to one batch tile.
# Layout: activations are (features, TB) with the batch tile on the lane axis.
# ----------------------------------------------------------------------------
def _fused_kan_kernel(x_ref, *refs, layer_cfgs):
    """refs = (baseW_0, splineW_0, ..., baseW_{L-1}, splineW_{L-1}, out_ref)."""
    out_ref = refs[-1]
    w_refs = refs[:-1]

    h = x_ref[...]                                   # (In_0, TB) f32, batch on lanes
    for li, cfg in enumerate(layer_cfgs):
        In = cfg.in_features
        S = cfg.num_bases0                           # n_knots - 1 (order-0 bases)
        order = cfg.spline_order
        coeff = cfg.coeff                            # grid_size + spline_order
        lo = cfg.grid_lo                             # python float
        dt = cfg.h_step                              # python float (uniform knot step)
        base_w = w_refs[2 * li][...]                 # (Out, In)        bf16
        spline_w = w_refs[2 * li + 1][...]           # (Out, coeff*In)  bf16

        x = h                                        # (In, TB) f32

        # ---- base branch: W_base @ SiLU(x)  (bf16 MXU, f32 accumulation) ----
        silu = x * jax.nn.sigmoid(x)                 # sigmoid -> EUP slot
        acc = jnp.dot(base_w, silu.astype(jnp.bfloat16),
                      preferred_element_type=jnp.float32)          # (Out, TB)

        # ---- Cox-de Boor B-splines on a full-lane-width (S*In, TB) slab ----
        # Row r = j*In + i holds data for basis j, input feature i.
        # d[r] = x_i - knots[j]; knots are uniform so knots[j] is a scalar per
        # strip (folded at trace time: no knot arrays, no divisions).
        d = jnp.concatenate([x - (lo + (j - order) * dt) for j in range(S)],
                            axis=0)                                # (S*In, TB) f32
        b = jnp.logical_and(d >= 0.0, d < dt).astype(jnp.float32)  # order-0 bases

        for k in range(1, order + 1):
            # neighbour b[j+1] strip: static sublane roll by In rows
            # (== pltpu.roll(b, -In, axis=0); aligned slices, cheap copies).
            nb = jnp.concatenate([b[In:, :], b[:In, :]], axis=0)
            # b_k,j = (x - t_j)/(k*dt) * b_{k-1,j} + (t_{j+k+1} - x)/(k*dt) * b_{k-1,j+1}
            b = (d * b + ((k + 1) * dt - d) * nb) * (1.0 / (k * dt))
            # rows >= (S-k)*In are garbage (wrap-around); they never reach the
            # valid [0, coeff*In) region consumed below.

        # ---- spline branch: one MXU matmul, K = coeff*In (128 / 256 here) ----
        spline_in = b[:coeff * In, :].astype(jnp.bfloat16)         # (coeff*In, TB)
        acc = acc + jnp.dot(spline_w, spline_in,
                            preferred_element_type=jnp.float32)    # (Out, TB)

        h = acc                                      # next layer input (VMEM only)

    out_ref[...] = h.astype(out_ref.dtype)           # lane-dense (out_l, TB) store


# ----------------------------------------------------------------------------
# VMEM working-set estimate (per review: include in-kernel temporaries).
# ----------------------------------------------------------------------------
def _layer_tile_bytes(p, tb):
    In, Out = p["in_features"], p["out_features"]
    rows = p["num_bases0"] * In
    coeff = p["coeff"]
    return tb * (4 * rows * 4                 # d slab, b, rolled b, per-step temp (f32)
                 + coeff * In * 2             # bf16 spline operand
                 + In * (2 * 4 + 2)           # layer input + SiLU (f32) + bf16 operand
                 + Out * 4)                   # f32 accumulator / next input


def _vmem_bytes_estimate(params, tb, in0, out_l):
    io = 2 * tb * (in0 + out_l) * 4           # double-buffered x / out tiles
    weights = sum(int(p["baseW"].size) * 2 + int(p["splineW"].size) * 2
                  for p in params)
    worst = max(_layer_tile_bytes(p, tb) for p in params)
    return io + weights + worst


# ----------------------------------------------------------------------------
# Wrapper: batch-tiled 1-D grid over the flattened leading dims.
# ----------------------------------------------------------------------------
def kan_forward(x, params, *, batch_tile=2048, vmem_cap_bytes=(32 << 20)):
    """x: (..., in_features).  batch_tile is the primary tuning knob
    (rows per grid step, rounded to a multiple of 128).  vmem_cap_bytes bounds
    the per-tile working set: keep the default (~32 MiB) on v7x (64 MiB VMEM);
    raise batch_tile to 4096-8192 and vmem_cap_bytes to ~96 MiB on v5e/v6e."""
    lead = x.shape[:-1]
    in0 = params[0]["in_features"]
    out_l = params[-1]["out_features"]

    x2 = x.reshape(-1, in0).astype(jnp.float32)
    b = x2.shape[0]

    # Batch tile: lane-dense multiple of 128, bounded by the VMEM cap.
    tb = max(128, (int(batch_tile) // 128) * 128)
    tb = min(tb, _round_up(b, 128))
    while tb > 128 and _vmem_bytes_estimate(params, tb, in0, out_l) > vmem_cap_bytes:
        tb -= 128
    bp = _round_up(b, tb)
    # Keep >= 2 grid steps when possible so both v7x TensorCores get work.
    if bp // tb == 1 and bp >= 256 and (bp // 2) % 128 == 0:
        tb = bp // 2

    if bp != b:
        x2 = jnp.pad(x2, ((0, bp - b), (0, 0)))
    xt = jnp.transpose(x2)                           # (in0, bp): feature-major

    layer_cfgs = tuple(
        LayerCfg(p["in_features"], p["out_features"], p["spline_order"],
                 p["num_bases0"], p["coeff"], p["grid_lo"], p["h_step"])
        for p in params)
    kernel = functools.partial(_fused_kan_kernel, layer_cfgs=layer_cfgs)

    weight_args = []
    in_specs = [pl.BlockSpec((in0, tb), lambda i: (0, i))]          # x: batch-tiled on lanes
    for p in params:
        weight_args.append(p["baseW"])
        weight_args.append(p["splineW"])
        in_specs.append(pl.BlockSpec(p["baseW"].shape, lambda i: (0, 0)))    # pinned
        in_specs.append(pl.BlockSpec(p["splineW"].shape, lambda i: (0, 0)))  # pinned
    out_spec = pl.BlockSpec((out_l, tb), lambda i: (0, i))          # lane-dense writeback

    est = _vmem_bytes_estimate(params, tb, in0, out_l)
    vmem_limit = int(min(max(2 * est, 32 << 20), 100 << 20))

    out_t = pl.pallas_call(
        kernel,
        out_shape=jax.ShapeDtypeStruct((out_l, bp), jnp.float32),
        grid=(bp // tb,),
        in_specs=in_specs,
        out_specs=out_spec,
        compiler_params=pltpu.CompilerParams(
            dimension_semantics=("parallel",),
            vmem_limit_bytes=vmem_limit,
        ),
    )(xt, *weight_args)

    return jnp.transpose(out_t)[:b].reshape(*lead, out_l)


# ----------------------------------------------------------------------------
# Parameter construction (deterministic, synthetic; kernel-friendly layouts)
# ----------------------------------------------------------------------------
def make_kan_params(key, layers_hidden, grid_size=5, spline_order=3,
                    grid_range=(-1.0, 1.0)):
    params = []
    lo, hi = float(grid_range[0]), float(grid_range[1])
    h = (hi - lo) / grid_size
    n_knots = grid_size + 2 * spline_order + 1
    coeff = grid_size + spline_order
    knots = jnp.asarray([lo + (j - spline_order) * h for j in range(n_knots)],
                        jnp.float32)

    for in_f, out_f in zip(layers_hidden, layers_hidden[1:]):
        key, k1, k2, k3 = jax.random.split(key, 4)
        bound = 1.0 / math.sqrt(in_f)
        base_weight = jax.random.uniform(k1, (out_f, in_f), jnp.float32,
                                         -bound, bound)
        spline_weight = jax.random.uniform(k2, (out_f, in_f, coeff), jnp.float32,
                                           -0.1, 0.1)
        spline_scaler = jax.random.uniform(k3, (out_f, in_f), jnp.float32,
                                           -bound, bound)
        scaled = spline_weight * spline_scaler[..., None]       # (Out, In, coeff)

        params.append(dict(
            in_features=in_f,
            out_features=out_f,
            spline_order=spline_order,
            grid_size=grid_size,
            coeff=coeff,
            num_bases0=n_knots - 1,
            grid_lo=lo,
            h_step=float(h),
            grid=jnp.broadcast_to(knots, (in_f, n_knots)),      # reference only
            # Feature-major MXU layouts, stored bf16 (f32 accumulation in-kernel):
            baseW=base_weight.astype(jnp.bfloat16),                          # (Out, In)
            splineW=jnp.transpose(scaled, (0, 2, 1))                         # (Out, coeff, In)
                      .reshape(out_f, coeff * in_f)
                      .astype(jnp.bfloat16),                                  # (Out, coeff*In), j-major
        ))
    return params


# ----------------------------------------------------------------------------
# Pure-JAX reference (same math, same bf16 MXU boundary) for correctness check
# ----------------------------------------------------------------------------
def _ref_layer(x, p):
    grid = p["grid"]                                  # (In, n_knots)
    order = p["spline_order"]
    base = jnp.dot(jax.nn.silu(x).astype(jnp.bfloat16),
                   jnp.transpose(p["baseW"]),
                   preferred_element_type=jnp.float32)
    xe = x[:, :, None]
    bases = jnp.logical_and(xe >= grid[None, :, :-1],
                            xe < grid[None, :, 1:]).astype(jnp.float32)
    for k in range(1, order + 1):
        bases = ((xe - grid[None, :, :-(k + 1)])
                 / (grid[None, :, k:-1] - grid[None, :, :-(k + 1)])
                 * bases[:, :, :-1]
                 + (grid[None, :, k + 1:] - xe)
                 / (grid[None, :, k + 1:] - grid[None, :, 1:-k])
                 * bases[:, :, 1:])
    nb, in_f, c = bases.shape
    flat = jnp.transpose(bases, (0, 2, 1)).reshape(nb, c * in_f)   # j-major, matches kernel
    spline = jnp.dot(flat.astype(jnp.bfloat16), jnp.transpose(p["splineW"]),
                     preferred_element_type=jnp.float32)
    return base + spline


def kan_forward_ref(x, params):
    lead = x.shape[:-1]
    out = x.reshape(-1, x.shape[-1]).astype(jnp.float32)
    for p in params:
        out = _ref_layer(out, p)
    return out.reshape(*lead, out.shape[-1])


# ----------------------------------------------------------------------------
if __name__ == "__main__":
    grid_size = 5
    spline_order = 3
    layers_hidden = [16, 32, 8]

    key = jax.random.PRNGKey(0)
    key, kx, kp = jax.random.split(key, 3)
    params = make_kan_params(kp, layers_hidden, grid_size=grid_size,
                             spline_order=spline_order)

    # input: leading dims (4, 8), last dim = in_features of the first layer
    x = jax.random.normal(kx, (4, 8, layers_hidden[0]), dtype=jnp.float32) * 0.5

    out = kan_forward(x, params)
    out = jax.block_until_ready(out)

    ref = kan_forward_ref(x, params)
    assert out.shape == (4, 8, layers_hidden[-1]), out.shape
    assert jnp.allclose(out, ref, rtol=2e-3, atol=2e-3), \
        float(jnp.max(jnp.abs(out - ref)))

    print("KERNEL_OK")
</pallas_src>

<mosaic_0001>
module attributes {stable_mosaic.version = 11 : i64} {
  func.func @_fused_kan_kernel(%arg0: i32, %arg1: memref<16x128xf32, #tpu.memory_space<vmem>>, %arg2: memref<32x16xbf16, #tpu.memory_space<vmem>>, %arg3: memref<32x128xbf16, #tpu.memory_space<vmem>>, %arg4: memref<8x32xbf16, #tpu.memory_space<vmem>>, %arg5: memref<8x256xbf16, #tpu.memory_space<vmem>>, %arg6: memref<8x128xf32, #tpu.memory_space<vmem>>) attributes {dimension_semantics = [#tpu.dimension_semantics<parallel>], iteration_bounds = array<i64: 1>, scalar_prefetch = 0 : i64, scratch_operands = 0 : i64, tpu.core_type = #tpu.core_type<tc>, window_params = [{transform_indices = @transform_0, window_bounds = array<i64: 16, 128>}, {pipeline_mode = #tpu.pipeline_mode<synchronous>, transform_indices = @transform_1, window_bounds = array<i64: 32, 16>}, {pipeline_mode = #tpu.pipeline_mode<synchronous>, transform_indices = @transform_2, window_bounds = array<i64: 32, 128>}, {pipeline_mode = #tpu.pipeline_mode<synchronous>, transform_indices = @transform_3, window_bounds = array<i64: 8, 32>}, {pipeline_mode = #tpu.pipeline_mode<synchronous>, transform_indices = @transform_4, window_bounds = array<i64: 8, 256>}, {transform_indices = @transform_5, window_bounds = array<i64: 8, 128>}]} {
    %c0 = arith.constant 0 : index
    %c0_0 = arith.constant 0 : index
    %0 = vector.load %arg1[%c0, %c0_0] : memref<16x128xf32, #tpu.memory_space<vmem>>, vector<16x128xf32>
    %c0_1 = arith.constant 0 : index
    %c0_2 = arith.constant 0 : index
    %1 = vector.load %arg2[%c0_1, %c0_2] : memref<32x16xbf16, #tpu.memory_space<vmem>>, vector<32x16xbf16>
    %c0_3 = arith.constant 0 : index
    %c0_4 = arith.constant 0 : index
    %2 = vector.load %arg3[%c0_3, %c0_4] : memref<32x128xbf16, #tpu.memory_space<vmem>>, vector<32x128xbf16>
    %3 = arith.negf %0 : vector<16x128xf32>
    %4 = math.exp %3 : vector<16x128xf32>
    %cst = arith.constant 1.000000e+00 : f32
    %5 = vector.broadcast %cst : f32 to vector<16x128xf32>
    %6 = arith.addf %5, %4 : vector<16x128xf32>
    %7 = arith.divf %5, %6 : vector<16x128xf32>
    %8 = arith.mulf %0, %7 : vector<16x128xf32>
    %9 = arith.truncf %8 : vector<16x128xf32> to vector<16x128xbf16>
    %cst_5 = arith.constant dense<0.000000e+00> : vector<32x128xf32>
    %10 = tpu.matmul %1, %9, %cst_5 {dimension_numbers = #tpu.dot_dimension_numbers<[1], [0], [0], [1], [0, 0, 1, 1], [], []>} : vector<32x16xbf16>, vector<16x128xbf16>, vector<32x128xf32> -> vector<32x128xf32>
    %cst_6 = arith.constant -2.200000e+00 : f32
    %11 = vector.broadcast %cst_6 : f32 to vector<16x128xf32>
    %12 = arith.subf %0, %11 : vector<16x128xf32>
    %cst_7 = arith.constant -1.800000e+00 : f32
    %13 = vector.broadcast %cst_7 : f32 to vector<16x128xf32>
    %14 = arith.subf %0, %13 : vector<16x128xf32>
    %cst_8 = arith.constant -1.400000e+00 : f32
    %15 = vector.broadcast %cst_8 : f32 to vector<16x128xf32>
    %16 = arith.subf %0, %15 : vector<16x128xf32>
    %cst_9 = arith.constant -1.000000e+00 : f32
    %17 = vector.broadcast %cst_9 : f32 to vector<16x128xf32>
    %18 = arith.subf %0, %17 : vector<16x128xf32>
    %cst_10 = arith.constant -6.000000e-01 : f32
    %19 = vector.broadcast %cst_10 : f32 to vector<16x128xf32>
    %20 = arith.subf %0, %19 : vector<16x128xf32>
    %cst_11 = arith.constant -2.000000e-01 : f32
    %21 = vector.broadcast %cst_11 : f32 to vector<16x128xf32>
    %22 = arith.subf %0, %21 : vector<16x128xf32>
    %cst_12 = arith.constant 2.000000e-01 : f32
    %23 = vector.broadcast %cst_12 : f32 to vector<16x128xf32>
    %24 = arith.subf %0, %23 : vector<16x128xf32>
    %cst_13 = arith.constant 6.000000e-01 : f32
    %25 = vector.broadcast %cst_13 : f32 to vector<16x128xf32>
    %26 = arith.subf %0, %25 : vector<16x128xf32>
    %cst_14 = arith.constant 1.000000e+00 : f32
    %27 = vector.broadcast %cst_14 : f32 to vector<16x128xf32>
    %28 = arith.subf %0, %27 : vector<16x128xf32>
    %cst_15 = arith.constant 1.400000e+00 : f32
    %29 = vector.broadcast %cst_15 : f32 to vector<16x128xf32>
    %30 = arith.subf %0, %29 : vector<16x128xf32>
    %cst_16 = arith.constant 1.800000e+00 : f32
    %31 = vector.broadcast %cst_16 : f32 to vector<16x128xf32>
    %32 = arith.subf %0, %31 : vector<16x128xf32>
    %33 = tpu.concatenate %12, %14, %16, %18, %20, %22, %24, %26, %28, %30, %32 in 0 : vector<16x128xf32>, vector<16x128xf32>, vector<16x128xf32>, vector<16x128xf32>, vector<16x128xf32>, vector<16x128xf32>, vector<16x128xf32>, vector<16x128xf32>, vector<16x128xf32>, vector<16x128xf32>, vector<16x128xf32> -> vector<176x128xf32>
    %cst_17 = arith.constant 0.000000e+00 : f32
    %34 = vector.broadcast %cst_17 : f32 to vector<176x128xf32>
    %35 = arith.cmpf oge, %33, %34 : vector<176x128xf32>
    %cst_18 = arith.constant 4.000000e-01 : f32
    %36 = vector.broadcast %cst_18 : f32 to vector<176x128xf32>
    %37 = arith.cmpf olt, %33, %36 : vector<176x128xf32>
    %38 = arith.andi %35, %37 : vector<176x128xi1>
    %39 = arith.extui %38 : vector<176x128xi1> to vector<176x128xi32>
    %40 = arith.sitofp %39 : vector<176x128xi32> to vector<176x128xf32>
    %41 = vector.extract_strided_slice %40 {offsets = [16, 0], sizes = [160, 128], strides = [1, 1]} : vector<176x128xf32> to vector<160x128xf32>
    %42 = vector.extract_strided_slice %40 {offsets = [0, 0], sizes = [16, 128], strides = [1, 1]} : vector<176x128xf32> to vector<16x128xf32>
    %43 = tpu.concatenate %41, %42 in 0 : vector<160x128xf32>, vector<16x128xf32> -> vector<176x128xf32>
    %44 = arith.mulf %33, %40 : vector<176x128xf32>
    %cst_19 = arith.constant 8.000000e-01 : f32
    %45 = vector.broadcast %cst_19 : f32 to vector<176x128xf32>
    %46 = arith.subf %45, %33 : vector<176x128xf32>
    %47 = arith.mulf %46, %43 : vector<176x128xf32>
    %48 = arith.addf %44, %47 : vector<176x128xf32>
    %cst_20 = arith.constant 2.500000e+00 : f32
    %49 = vector.broadcast %cst_20 : f32 to vector<176x128xf32>
    %50 = arith.mulf %48, %49 : vector<176x128xf32>
    %51 = vector.extract_strided_slice %50 {offsets = [16, 0], sizes = [160, 128], strides = [1, 1]} : vector<176x128xf32> to vector<160x128xf32>
    %52 = vector.extract_strided_slice %50 {offsets = [0, 0], sizes = [16, 128], strides = [1, 1]} : vector<176x128xf32> to vector<16x128xf32>
    %53 = tpu.concatenate %51, %52 in 0 : vector<160x128xf32>, vector<16x128xf32> -> vector<176x128xf32>
    %54 = arith.mulf %33, %50 : vector<176x128xf32>
    %cst_21 = arith.constant 1.200000e+00 : f32
    %55 = vector.broadcast %cst_21 : f32 to vector<176x128xf32>
    %56 = arith.subf %55, %33 : vector<176x128xf32>
    %57 = arith.mulf %56, %53 : vector<176x128xf32>
    %58 = arith.addf %54, %57 : vector<176x128xf32>
    %cst_22 = arith.constant 1.250000e+00 : f32
    %59 = vector.broadcast %cst_22 : f32 to vector<176x128xf32>
    %60 = arith.mulf %58, %59 : vector<176x128xf32>
    %61 = vector.extract_strided_slice %60 {offsets = [16, 0], sizes = [160, 128], strides = [1, 1]} : vector<176x128xf32> to vector<160x128xf32>
    %62 = vector.extract_strided_slice %60 {offsets = [0, 0], sizes = [16, 128], strides = [1, 1]} : vector<176x128xf32> to vector<16x128xf32>
    %63 = tpu.concatenate %61, %62 in 0 : vector<160x128xf32>, vector<16x128xf32> -> vector<176x128xf32>
    %64 = arith.mulf %33, %60 : vector<176x128xf32>
    %cst_23 = arith.constant 1.600000e+00 : f32
    %65 = vector.broadcast %cst_23 : f32 to vector<176x128xf32>
    %66 = arith.subf %65, %33 : vector<176x128xf32>
    %67 = arith.mulf %66, %63 : vector<176x128xf32>
    %68 = arith.addf %64, %67 : vector<176x128xf32>
    %cst_24 = arith.constant 0.833333313 : f32
    %69 = vector.broadcast %cst_24 : f32 to vector<176x128xf32>
    %70 = arith.mulf %68, %69 : vector<176x128xf32>
    %71 = vector.extract_strided_slice %70 {offsets = [0, 0], sizes = [128, 128], strides = [1, 1]} : vector<176x128xf32> to vector<128x128xf32>
    %72 = arith.truncf %71 : vector<128x128xf32> to vector<128x128xbf16>
    %cst_25 = arith.constant dense<0.000000e+00> : vector<32x128xf32>
    %73 = tpu.matmul %2, %72, %cst_25 {dimension_numbers = #tpu.dot_dimension_numbers<[1], [0], [0], [1], [0, 0, 1, 1], [], []>} : vector<32x128xbf16>, vector<128x128xbf16>, vector<32x128xf32> -> vector<32x128xf32>
    %74 = arith.addf %10, %73 : vector<32x128xf32>
    %c0_26 = arith.constant 0 : index
    %c0_27 = arith.constant 0 : index
    %75 = vector.load %arg4[%c0_26, %c0_27] : memref<8x32xbf16, #tpu.memory_space<vmem>>, vector<8x32xbf16>
    %c0_28 = arith.constant 0 : index
    %c0_29 = arith.constant 0 : index
    %76 = vector.load %arg5[%c0_28, %c0_29] : memref<8x256xbf16, #tpu.memory_space<vmem>>, vector<8x256xbf16>
    %77 = arith.negf %74 : vector<32x128xf32>
    %78 = math.exp %77 : vector<32x128xf32>
    %cst_30 = arith.constant 1.000000e+00 : f32
    %79 = vector.broadcast %cst_30 : f32 to vector<32x128xf32>
    %80 = arith.addf %79, %78 : vector<32x128xf32>
    %81 = arith.divf %79, %80 : vector<32x128xf32>
    %82 = arith.mulf %74, %81 : vector<32x128xf32>
    %83 = arith.truncf %82 : vector<32x128xf32> to vector<32x128xbf16>
    %cst_31 = arith.constant dense<0.000000e+00> : vector<8x128xf32>
    %84 = tpu.matmul %75, %83, %cst_31 {dimension_numbers = #tpu.dot_dimension_numbers<[1], [0], [0], [1], [0, 0, 1, 1], [], []>} : vector<8x32xbf16>, vector<32x128xbf16>, vector<8x128xf32> -> vector<8x128xf32>
    %cst_32 = arith.constant -2.200000e+00 : f32
    %85 = vector.broadcast %cst_32 : f32 to vector<32x128xf32>
    %86 = arith.subf %74, %85 : vector<32x128xf32>
    %cst_33 = arith.constant -1.800000e+00 : f32
    %87 = vector.broadcast %cst_33 : f32 to vector<32x128xf32>
    %88 = arith.subf %74, %87 : vector<32x128xf32>
    %cst_34 = arith.constant -1.400000e+00 : f32
    %89 = vector.broadcast %cst_34 : f32 to vector<32x128xf32>
    %90 = arith.subf %74, %89 : vector<32x128xf32>
    %cst_35 = arith.constant -1.000000e+00 : f32
    %91 = vector.broadcast %cst_35 : f32 to vector<32x128xf32>
    %92 = arith.subf %74, %91 : vector<32x128xf32>
    %cst_36 = arith.constant -6.000000e-01 : f32
    %93 = vector.broadcast %cst_36 : f32 to vector<32x128xf32>
    %94 = arith.subf %74, %93 : vector<32x128xf32>
    %cst_37 = arith.constant -2.000000e-01 : f32
    %95 = vector.broadcast %cst_37 : f32 to vector<32x128xf32>
    %96 = arith.subf %74, %95 : vector<32x128xf32>
    %cst_38 = arith.constant 2.000000e-01 : f32
    %97 = vector.broadcast %cst_38 : f32 to vector<32x128xf32>
    %98 = arith.subf %74, %97 : vector<32x128xf32>
    %cst_39 = arith.constant 6.000000e-01 : f32
    %99 = vector.broadcast %cst_39 : f32 to vector<32x128xf32>
    %100 = arith.subf %74, %99 : vector<32x128xf32>
    %cst_40 = arith.constant 1.000000e+00 : f32
    %101 = vector.broadcast %cst_40 : f32 to vector<32x128xf32>
    %102 = arith.subf %74, %101 : vector<32x128xf32>
    %cst_41 = arith.constant 1.400000e+00 : f32
    %103 = vector.broadcast %cst_41 : f32 to vector<32x128xf32>
    %104 = arith.subf %74, %103 : vector<32x128xf32>
    %cst_42 = arith.constant 1.800000e+00 : f32
    %105 = vector.broadcast %cst_42 : f32 to vector<32x128xf32>
    %106 = arith.subf %74, %105 : vector<32x128xf32>
    %107 = tpu.concatenate %86, %88, %90, %92, %94, %96, %98, %100, %102, %104, %106 in 0 : vector<32x128xf32>, vector<32x128xf32>, vector<32x128xf32>, vector<32x128xf32>, vector<32x128xf32>, vector<32x128xf32>, vector<32x128xf32>, vector<32x128xf32>, vector<32x128xf32>, vector<32x128xf32>, vector<32x128xf32> -> vector<352x128xf32>
    %cst_43 = arith.constant 0.000000e+00 : f32
    %108 = vector.broadcast %cst_43 : f32 to vector<352x128xf32>
    %109 = arith.cmpf oge, %107, %108 : vector<352x128xf32>
    %cst_44 = arith.constant 4.000000e-01 : f32
    %110 = vector.broadcast %cst_44 : f32 to vector<352x128xf32>
    %111 = arith.cmpf olt, %107, %110 : vector<352x128xf32>
    %112 = arith.andi %109, %111 : vector<352x128xi1>
    %113 = arith.extui %112 : vector<352x128xi1> to vector<352x128xi32>
    %114 = arith.sitofp %113 : vector<352x128xi32> to vector<352x128xf32>
    %115 = vector.extract_strided_slice %114 {offsets = [32, 0], sizes = [320, 128], strides = [1, 1]} : vector<352x128xf32> to vector<320x128xf32>
    %116 = vector.extract_strided_slice %114 {offsets = [0, 0], sizes = [32, 128], strides = [1, 1]} : vector<352x128xf32> to vector<32x128xf32>
    %117 = tpu.concatenate %115, %116 in 0 : vector<320x128xf32>, vector<32x128xf32> -> vector<352x128xf32>
    %118 = arith.mulf %107, %114 : vector<352x128xf32>
    %cst_45 = arith.constant 8.000000e-01 : f32
    %119 = vector.broadcast %cst_45 : f32 to vector<352x128xf32>
    %120 = arith.subf %119, %107 : vector<352x128xf32>
    %121 = arith.mulf %120, %117 : vector<352x128xf32>
    %122 = arith.addf %118, %121 : vector<352x128xf32>
    %cst_46 = arith.constant 2.500000e+00 : f32
    %123 = vector.broadcast %cst_46 : f32 to vector<352x128xf32>
    %124 = arith.mulf %122, %123 : vector<352x128xf32>
    %125 = vector.extract_strided_slice %124 {offsets = [32, 0], sizes = [320, 128], strides = [1, 1]} : vector<352x128xf32> to vector<320x128xf32>
    %126 = vector.extract_strided_slice %124 {offsets = [0, 0], sizes = [32, 128], strides = [1, 1]} : vector<352x128xf32> to vector<32x128xf32>
    %127 = tpu.concatenate %125, %126 in 0 : vector<320x128xf32>, vector<32x128xf32> -> vector<352x128xf32>
    %128 = arith.mulf %107, %124 : vector<352x128xf32>
    %cst_47 = arith.constant 1.200000e+00 : f32
    %129 = vector.broadcast %cst_47 : f32 to vector<352x128xf32>
    %130 = arith.subf %129, %107 : vector<352x128xf32>
    %131 = arith.mulf %130, %127 : vector<352x128xf32>
    %132 = arith.addf %128, %131 : vector<352x128xf32>
    %cst_48 = arith.constant 1.250000e+00 : f32
    %133 = vector.broadcast %cst_48 : f32 to vector<352x128xf32>
    %134 = arith.mulf %132, %133 : vector<352x128xf32>
    %135 = vector.extract_strided_slice %134 {offsets = [32, 0], sizes = [320, 128], strides = [1, 1]} : vector<352x128xf32> to vector<320x128xf32>
    %136 = vector.extract_strided_slice %134 {offsets = [0, 0], sizes = [32, 128], strides = [1, 1]} : vector<352x128xf32> to vector<32x128xf32>
    %137 = tpu.concatenate %135, %136 in 0 : vector<320x128xf32>, vector<32x128xf32> -> vector<352x128xf32>
    %138 = arith.mulf %107, %134 : vector<352x128xf32>
    %cst_49 = arith.constant 1.600000e+00 : f32
    %139 = vector.broadcast %cst_49 : f32 to vector<352x128xf32>
    %140 = arith.subf %139, %107 : vector<352x128xf32>
    %141 = arith.mulf %140, %137 : vector<352x128xf32>
    %142 = arith.addf %138, %141 : vector<352x128xf32>
    %cst_50 = arith.constant 0.833333313 : f32
    %143 = vector.broadcast %cst_50 : f32 to vector<352x128xf32>
    %144 = arith.mulf %142, %143 : vector<352x128xf32>
    %145 = vector.extract_strided_slice %144 {offsets = [0, 0], sizes = [256, 128], strides = [1, 1]} : vector<352x128xf32> to vector<256x128xf32>
    %146 = arith.truncf %145 : vector<256x128xf32> to vector<256x128xbf16>
    %cst_51 = arith.constant dense<0.000000e+00> : vector<8x128xf32>
    %147 = tpu.matmul %76, %146, %cst_51 {dimension_numbers = #tpu.dot_dimension_numbers<[1], [0], [0], [1], [0, 0, 1, 1], [], []>} : vector<8x256xbf16>, vector<256x128xbf16>, vector<8x128xf32> -> vector<8x128xf32>
    %148 = arith.addf %84, %147 : vector<8x128xf32>
    %c0_52 = arith.constant 0 : index
    %c0_53 = arith.constant 0 : index
    %149 = vector.load %arg6[%c0_52, %c0_53] : memref<8x128xf32, #tpu.memory_space<vmem>>, vector<8x128xf32>
    tpu.vector_store %arg6[%c0_52, %c0_53], %148 {strides = array<i32>} : memref<8x128xf32, #tpu.memory_space<vmem>>, vector<8x128xf32>,
    return
  }
  func.func @transform_0(%arg0: i32) -> (i32, i32) {
    %c0_i32 = arith.constant 0 : i32
    %c0_i32_0 = arith.constant 0 : i32
    return %c0_i32, %arg0 : i32, i32
  }
  func.func @transform_1(%arg0: i32) -> (i32, i32) {
    %c0_i32 = arith.constant 0 : i32
    %c0_i32_0 = arith.constant 0 : i32
    %c0_i32_1 = arith.constant 0 : i32
    return %c0_i32, %c0_i32_0 : i32, i32
  }
  func.func @transform_2(%arg0: i32) -> (i32, i32) {
    %c0_i32 = arith.constant 0 : i32
    %c0_i32_0 = arith.constant 0 : i32
    %c0_i32_1 = arith.constant 0 : i32
    return %c0_i32, %c0_i32_0 : i32, i32
  }
  func.func @transform_3(%arg0: i32) -> (i32, i32) {
    %c0_i32 = arith.constant 0 : i32
    %c0_i32_0 = arith.constant 0 : i32
    %c0_i32_1 = arith.constant 0 : i32
    return %c0_i32, %c0_i32_0 : i32, i32
  }
  func.func @transform_4(%arg0: i32) -> (i32, i32) {
    %c0_i32 = arith.constant 0 : i32
    %c0_i32_0 = arith.constant 0 : i32
    %c0_i32_1 = arith.constant 0 : i32
    return %c0_i32, %c0_i32_0 : i32, i32
  }
  func.func @transform_5(%arg0: i32) -> (i32, i32) {
    %c0_i32 = arith.constant 0 : i32
    %c0_i32_0 = arith.constant 0 : i32
    return %c0_i32, %arg0 : i32, i32
  }
}

</mosaic_0001>

<bundles_post_ra>
// kernel: tpu_custom_call.1
= control target key start
LH: loop header
LB: loop body
LE: loop exit
PB: predicated region body
PF: predicated region fallthrough
CT: control target
= control target key end

     0   :  { %10 = vsyncpa [#allocation3], 0  ;;  %s3088_s0 = inlined_call_operand.vmem [shape: f32[16,128], index: 0, kind: input, shape index: {}]   ;;  %s3089_s1 = inlined_call_operand.vmem [shape: bf16[32,16], index: 1, kind: input, shape index: {}]   ;;  %s3090_s2 = inlined_call_operand.hbm [shape: bf16[32,128], index: 2, kind: input, shape index: {}]   ;;  %s3091_s3 = inlined_call_operand.hbm [shape: bf16[8,32], index: 3, kind: input, shape index: {}]   ;;  %s3092_s4 = inlined_call_operand.vmem [shape: bf16[8,256], index: 4, kind: input, shape index: {}]   ;;  %s3093_s5 = inlined_call_operand.hbm [shape: f32[8,128], index: 5, kind: output, shape index: {}]  }
   0x1   :  { %11 = vsyncpa [#allocation6], 0 }
   0x2   :  { %12 = vsyncpa [#allocation4], 0  ;;  %s21_s20 = sshll.u32 %s3090_s2, 4  ;;  %s1822_s21 = smov [#allocation2]   ;;  %s22_s20 = int_to_ptr.hbm [resolvable:$true] %s21_s20 }
   0x3   :  { %s23_s22 = sshll.u32 %s1822_s21, 4  ;;  %s35_s25 = sshll.u32 %s3091_s3, 4  ;;  %s24_s22 = int_to_ptr.vmem [resolvable:$true] %s23_s22  ;;  %s36_s25 = int_to_ptr.hbm [resolvable:$true] %s35_s25 }
   0x4   :  { %s1823_s26 = smov 64   ;;  %s1824_s27 = smov 4  }
   0x5   :  { %29 = dma.hbm_to_vmem [thread:$0]  %s22_s20, 256, %s24_s22, [#allocation3], %s1823_s26, %s1823_s26, %s1824_s27  }
   0x6   :  { %s1825_s28 = smov [#allocation5]  }
   0x7   :  { %s37_s29 = sshll.u32 %s1825_s28, 4  ;;  %s38_s29 = int_to_ptr.vmem [resolvable:$true] %s37_s29 }
   0x8   :  { %40 = dma.hbm_to_vmem [thread:$0]  %s36_s25, 64, %s38_s29, [#allocation6]  }
   0x9   :  { %1816 = dma.done.wait [#allocation3], 256  }
   0xa   :  { %1817 = vsyncadd [#allocation3], 4294967040 }
   0xb   :  { %1818 = dma.done.wait [#allocation6], 64  }
   0xc   :  { %1819 = vsyncadd [#allocation6], 4294967232  ;;  %v1867_v0 = vld [vmem:[%s3088_s0] sm:$0xff]  ;;  %v1872_v1 = vld [vmem:[%s3088_s0 + $0x8] sm:$0xff]  ;;  %v3102_v10 = vmov 0.0   ;;  %s1542_s14 = sshll.u32 %s3093_s5, 4  ;;  %s1543_s14 = int_to_ptr.hbm [resolvable:$true] %s1542_s14 }
   0xd   :  { %v1875_v2 = vadd.f32 -0.6, %v1867_v0  ;;  %v1878_v3 = vadd.f32 -0.6, %v1872_v1  ;;  %v1881_v4 = vadd.f32 -1.0, %v1867_v0  ;;  %v1884_v5 = vadd.f32 -1.0, %v1872_v1 }
   0xe   :  { %v1573_v6 = vadd.f32 -1.4, %v1867_v0  ;;  %v1574_v7 = vadd.f32 -1.4, %v1872_v1  ;;  %v1575_v8 = vadd.f32 -1.8, %v1867_v0 }
   0xf   :  { %v1576_v9 = vadd.f32 -1.8, %v1872_v1  ;;  %vm139_vm0 = vcmp.ge.f32.partialorder %v1875_v2, 0.0  ;;  %vm161_vm8 = vcmp.lt.f32.partialorder %v1875_v2, 0.4  ;;  %vm3129_vm2 = vcmp.ge.f32.partialorder %v1878_v3, 0.0 }
  0x10   :  { %vm143_vm4 = vcmp.ge.f32.partialorder %v1573_v6, 0.0  ;;  %vm162_vm9 = vcmp.lt.f32.partialorder %v1878_v3, 0.4  ;;  %vm163_vm10 = vcmp.lt.f32.partialorder %v1881_v4, 0.4  ;;  %vm183_vm13 = vmand %vm139_vm0, %vm161_vm8  ;;  %vm3130_vm5 = vcmp.ge.f32.partialorder %v1881_v4, 0.0 }
  0x11   :  { %vm146_vm7 = vcmp.ge.f32.partialorder %v1576_v9, 0.0  ;;  %vm164_vm11 = vcmp.lt.f32.partialorder %v1884_v5, 0.4  ;;  %vm165_vm12 = vcmp.lt.f32.partialorder %v1573_v6, 0.4  ;;  %vm184_vm3 = vmand %vm3129_vm2, %vm162_vm9  ;;  %v1903_v11 = vsel %vm183_vm13, 1.0, %v3102_v10 }
  0x12   :  { %vm166_vm14 = vcmp.lt.f32.partialorder %v1574_v7, 0.4  ;;  %vm167_vm15 = vcmp.lt.f32.partialorder %v1575_v8, 0.4  ;;  %vm168_vm1 = vcmp.lt.f32.partialorder %v1576_v9, 0.4  ;;  %vm185_vm6 = vmand %vm3130_vm5, %vm163_vm10  ;;  %v249_v16 = vmul.f32 %v1903_v11, %v1875_v2 }
  0x13   :  { %v1906_v12 = vsel %vm184_vm3, 1.0, %v3102_v10  ;;  %v269_v13 = vsub.f32 0.8, %v1875_v2  ;;  %v270_v14 = vsub.f32 0.8, %v1878_v3  ;;  %vm3131_vm0 = vcmp.ge.f32.partialorder %v1884_v5, 0.0  ;;  %vm187_vm2 = vmand %vm143_vm4, %vm165_vm12 }
  0x14   :  { %vm186_vm8 = vmand %vm3131_vm0, %vm164_vm11  ;;  %v1593_v15 = vsel %vm185_vm6, 1.0, %v3102_v10  ;;  %v250_v17 = vmul.f32 %v1906_v12, %v1878_v3  ;;  %v271_v18 = vsub.f32 0.8, %v1881_v4  ;;  %v272_v21 = vsub.f32 0.8, %v1884_v5 }
  0x15   :  { %v1594_v19 = vsel %vm186_vm8, 1.0, %v3102_v10  ;;  %v251_v20 = vmul.f32 %v1593_v15, %v1881_v4  ;;  %v273_v22 = vsub.f32 0.8, %v1573_v6  ;;  %vm3132_vm3 = vcmp.ge.f32.partialorder %v1574_v7, 0.0  ;;  %vm190_vm4 = vmand %vm146_vm7, %vm168_vm1 }
  0x16   :  { %vm188_vm5 = vmand %vm3132_vm3, %vm166_vm14  ;;  %v1595_v23 = vsel %vm187_vm2, 1.0, %v3102_v10  ;;  %v252_v24 = vmul.f32 %v1594_v19, %v1884_v5  ;;  %v274_v25 = vsub.f32 0.8, %v1574_v7  ;;  %v289_v26 = vmul.f32 %v1593_v15, %v269_v13 }
  0x17   :  { %vm3133_vm6 = vcmp.ge.f32.partialorder %v1575_v8, 0.0  ;;  %v1596_v27 = vsel %vm188_vm5, 1.0, %v3102_v10  ;;  %v253_v28 = vmul.f32 %v1595_v23, %v1573_v6  ;;  %v290_v29 = vmul.f32 %v1594_v19, %v270_v14 }
  0x18   :  { %vm189_vm9 = vmand %vm3133_vm6, %vm167_vm15  ;;  %v291_v30 = vmul.f32 %v1595_v23, %v271_v18  ;;  %v254_v32 = vmul.f32 %v1596_v27, %v1574_v7  ;;  %v292_v33 = vmul.f32 %v1596_v27, %v272_v21  ;;  %v309_v34 = vadd.f32 %v289_v26, %v249_v16 }
  0x19   :  { %v1597_v31 = vsel %vm189_vm9, 1.0, %v3102_v10  ;;  %v1598_v35 = vsel %vm190_vm4, 1.0, %v3102_v10  ;;  %v310_v37 = vadd.f32 %v290_v29, %v250_v17  ;;  %v367_v42 = vsub.f32 1.2, %v1875_v2 }
  0x1a   :  { %v293_v36 = vmul.f32 %v1597_v31, %v273_v22  ;;  %v311_v38 = vadd.f32 %v291_v30, %v251_v20  ;;  %v294_v39 = vmul.f32 %v1598_v35, %v274_v25  ;;  %v312_v40 = vadd.f32 %v292_v33, %v252_v24 }
  0x1b   :  { %v329_v41 = vmul.f32 2.5, %v309_v34  ;;  %v330_v44 = vmul.f32 2.5, %v310_v37  ;;  %v368_v46 = vsub.f32 1.2, %v1878_v3  ;;  %v369_v50 = vsub.f32 1.2, %v1881_v4 }
  0x1c   :  { %v313_v43 = vadd.f32 %v293_v36, %v253_v28  ;;  %v331_v45 = vmul.f32 2.5, %v311_v38  ;;  %v314_v47 = vadd.f32 %v294_v39, %v254_v32  ;;  %v332_v48 = vmul.f32 2.5, %v312_v40 }
  0x1d   :  { %v349_v49 = vmul.f32 %v1875_v2, %v329_v41  ;;  %v350_v52 = vmul.f32 %v1878_v3, %v330_v44  ;;  %v370_v54 = vsub.f32 1.2, %v1884_v5  ;;  %v455_v60 = vsub.f32 1.6, %v1875_v2 }
  0x1e   :  { %v333_v51 = vmul.f32 2.5, %v313_v43  ;;  %v351_v53 = vmul.f32 %v1881_v4, %v331_v45  ;;  %v334_v55 = vmul.f32 2.5, %v314_v47  ;;  %v352_v56 = vmul.f32 %v1884_v5, %v332_v48 }
  0x1f   :  { %v385_v57 = vmul.f32 %v367_v42, %v331_v45  ;;  %v386_v58 = vmul.f32 %v368_v46, %v332_v48  ;;  %v456_v61 = vsub.f32 1.6, %v1878_v3  ;;  %v1945_v62 = vadd.f32 -0.2, %v1867_v0 }
  0x20   :  { %v387_v59 = vmul.f32 %v369_v50, %v333_v51  ;;  %v388_v63 = vmul.f32 %v370_v54, %v334_v55  ;;  %v1948_v4 = vadd.f32 -0.2, %v1872_v1  ;;  %v1969_v40 = vadd.f32 0.2, %v1867_v0 }
  0x21   :  { %v403_v6 = vadd.f32 %v385_v57, %v349_v49  ;;  %v404_v7 = vadd.f32 %v386_v58, %v350_v52  ;;  %vm137_vm1 = vcmp.ge.f32.partialorder %v1945_v62, 0.0  ;;  %vm159_vm7 = vcmp.lt.f32.partialorder %v1945_v62, 0.4 }
  0x22   :  { %v405_v8 = vadd.f32 %v387_v59, %v351_v53  ;;  %v267_v5 = vsub.f32 0.8, %v1945_v62  ;;  %v406_v9 = vadd.f32 %v388_v63, %v352_v56  ;;  %vm138_vm10 = vcmp.ge.f32.partialorder %v1948_v4, 0.0  ;;  %vm181_vm11 = vmand %vm137_vm1, %vm159_vm7 }
  0x23   :  { %v421_v13 = vmul.f32 1.25, %v403_v6  ;;  %v422_v14 = vmul.f32 1.25, %v404_v7  ;;  %vm160_vm12 = vcmp.lt.f32.partialorder %v1948_v4, 0.4  ;;  %v1589_v16 = vsel %vm181_vm11, 1.0, %v3102_v10 }
  0x24   :  { %v423_v15 = vmul.f32 1.25, %v405_v8  ;;  %v268_v17 = vsub.f32 0.8, %v1948_v4  ;;  %v424_v18 = vmul.f32 1.25, %v406_v9  ;;  %vm182_vm13 = vmand %vm138_vm10, %vm160_vm12  ;;  %v247_v21 = vmul.f32 %v1589_v16, %v1945_v62 }
  0x25   :  { %v439_v19 = vmul.f32 %v1875_v2, %v421_v13  ;;  %v440_v20 = vmul.f32 %v1878_v3, %v422_v14  ;;  %v1590_v23 = vsel %vm182_vm13, 1.0, %v3102_v10  ;;  %v287_v24 = vmul.f32 %v1903_v11, %v267_v5 }
  0x26   :  { %v471_v22 = vmul.f32 %v455_v60, %v423_v15  ;;  %v288_v25 = vmul.f32 %v1906_v12, %v268_v17  ;;  %v472_v26 = vmul.f32 %v456_v61, %v424_v18  ;;  %v248_v27 = vmul.f32 %v1590_v23, %v1948_v4 }
  0x27   :  { %v365_v28 = vsub.f32 1.2, %v1945_v62  ;;  %v366_v29 = vsub.f32 1.2, %v1948_v4  ;;  %v307_v30 = vadd.f32 %v287_v24, %v247_v21  ;;  %v453_v3 = vsub.f32 1.6, %v1945_v62 }
  0x28   :  { %v487_v2 = vadd.f32 %v471_v22, %v439_v19  ;;  %v454_v31 = vsub.f32 1.6, %v1948_v4  ;;  %v488_v32 = vadd.f32 %v472_v26, %v440_v20  ;;  %v308_v33 = vadd.f32 %v288_v25, %v248_v27 }
  0x29   :  { %v383_v34 = vmul.f32 %v365_v28, %v329_v41  ;;  %v327_v11 = vmul.f32 2.5, %v307_v30  ;;  %v384_v36 = vmul.f32 %v366_v29, %v330_v44  ;;  %v469_v12 = vmul.f32 %v453_v3, %v421_v13 }
  0x2a   :  { %v503_v35 = vmul.f32 0.8333333, %v487_v2  ;;  %v504_v37 = vmul.f32 0.8333333, %v488_v32  ;;  %v328_v38 = vmul.f32 2.5, %v308_v33  ;;  %v470_v39 = vmul.f32 %v454_v31, %v422_v14 }
  0x2b   :  { %v347_v42 = vmul.f32 %v1945_v62, %v327_v11  ;;  %v1973_v43 = vadd.f32 0.2, %v1872_v1  ;;  %v1976_v45 = vadd.f32 0.6, %v1867_v0  ;;  %v1979_v41 = vadd.f32 0.6, %v1872_v1 }
  0x2c   :  { %v512_v46 = vpack.c.bf16 %v504_v37, %v503_v35  ;;  %v348_v44 = vmul.f32 %v1948_v4, %v328_v38  ;;  %vm135_vm14 = vcmp.ge.f32.partialorder %v1969_v40, 0.0  ;;  %vm157_vm15 = vcmp.lt.f32.partialorder %v1969_v40, 0.4 }
  0x2d   :  { %v401_v47 = vadd.f32 %v383_v34, %v347_v42  ;;  %vm136_vm0 = vcmp.ge.f32.partialorder %v1973_v43, 0.0  ;;  %vm158_vm8 = vcmp.lt.f32.partialorder %v1973_v43, 0.4  ;;  %vm179_vm2 = vmand %vm135_vm14, %vm157_vm15  ;;  %v265_v48 = vsub.f32 0.8, %v1969_v40 }
  0x2e   :  { %525 = vmatpush.bf16.msra.mxu0 %v512_v46  ;;  %v402_v49 = vadd.f32 %v384_v36, %v348_v44  ;;  %vm180_vm3 = vmand %vm136_vm0, %vm158_vm8  ;;  %v1587_v50 = vsel %vm179_vm2, 1.0, %v3102_v10  ;;  %v266_v51 = vsub.f32 0.8, %v1973_v43  ;;  %v363_v52 = vsub.f32 1.2, %v1969_v40 }
  0x2f   :  { %v419_v53 = vmul.f32 1.25, %v401_v47  ;;  %v1588_v54 = vsel %vm180_vm3, 1.0, %v3102_v10  ;;  %v245_v55 = vmul.f32 %v1587_v50, %v1969_v40  ;;  %v285_v56 = vmul.f32 %v1589_v16, %v265_v48 }
  0x30   :  { %v420_v57 = vmul.f32 1.25, %v402_v49  ;;  %v246_v58 = vmul.f32 %v1588_v54, %v1973_v43  ;;  %v286_v59 = vmul.f32 %v1590_v23, %v266_v51  ;;  %v364_v60 = vsub.f32 1.2, %v1973_v43 }
  0x31   :  { %v437_v61 = vmul.f32 %v1945_v62, %v419_v53  ;;  %v305_v63 = vadd.f32 %v285_v56, %v245_v55  ;;  %v451_v6 = vsub.f32 1.6, %v1969_v40  ;;  %v1997_v7 = vadd.f32 1.0, %v1867_v0 }
  0x32   :  { %v438_v8 = vmul.f32 %v1948_v4, %v420_v57  ;;  %v306_v5 = vadd.f32 %v286_v59, %v246_v58  ;;  %v381_v9 = vmul.f32 %v363_v52, %v327_v11  ;;  %v382_v13 = vmul.f32 %v364_v60, %v328_v38 }
  0x33   :  { %v485_v14 = vadd.f32 %v469_v12, %v437_v61  ;;  %v325_v15 = vmul.f32 2.5, %v305_v63  ;;  %v452_v16 = vsub.f32 1.6, %v1973_v43  ;;  %vm133_vm5 = vcmp.ge.f32.partialorder %v1976_v45, 0.0 }
  0x34   :  { %v486_v17 = vadd.f32 %v470_v39, %v438_v8  ;;  %v326_v18 = vmul.f32 2.5, %v306_v5  ;;  %v467_v62 = vmul.f32 %v451_v6, %v419_v53  ;;  %vm134_vm6 = vcmp.ge.f32.partialorder %v1979_v41, 0.0 }
  0x35   :  { %v501_v19 = vmul.f32 0.8333333, %v485_v14  ;;  %v345_v20 = vmul.f32 %v1969_v40, %v325_v15  ;;  %vm155_vm9 = vcmp.lt.f32.partialorder %v1976_v45, 0.4  ;;  %vm156_vm4 = vcmp.lt.f32.partialorder %v1979_v41, 0.4 }
  0x36   :  { %v502_v4 = vmul.f32 0.8333333, %v486_v17  ;;  %v346_v21 = vmul.f32 %v1973_v43, %v326_v18  ;;  %vm177_vm1 = vmand %vm133_vm5, %vm155_vm9  ;;  %v263_v22 = vsub.f32 0.8, %v1976_v45  ;;  %v264_v23 = vsub.f32 0.8, %v1979_v41 }
  0x37   :  { %v399_v24 = vadd.f32 %v381_v9, %v345_v20  ;;  %vm178_vm7 = vmand %vm134_vm6, %vm156_vm4  ;;  %v1585_v25 = vsel %vm177_vm1, 1.0, %v3102_v10  ;;  %v361_v26 = vsub.f32 1.2, %v1976_v45  ;;  %v362_v27 = vsub.f32 1.2, %v1979_v41 }
  0x38   :  { %v511_v28 = vpack.c.bf16 %v502_v4, %v501_v19  ;;  %v400_v29 = vadd.f32 %v382_v13, %v346_v21  ;;  %v1586_v2 = vsel %vm178_vm7, 1.0, %v3102_v10  ;;  %v243_v30 = vmul.f32 %v1585_v25, %v1976_v45 }
  0x39   :  { %v417_v3 = vmul.f32 1.25, %v399_v24  ;;  %v244_v31 = vmul.f32 %v1586_v2, %v1979_v41  ;;  %v283_v32 = vmul.f32 %v1587_v50, %v263_v22  ;;  %v284_v33 = vmul.f32 %v1588_v54, %v264_v23 }
  0x3a   :  { %526 = vmatpush.bf16.msra.mxu0 %v511_v28  ;;  %v418_v34 = vmul.f32 1.25, %v400_v29  ;;  %v468_v35 = vmul.f32 %v452_v16, %v420_v57  ;;  %v379_v11 = vmul.f32 %v361_v26, %v325_v15  ;;  %v449_v36 = vsub.f32 1.6, %v1976_v45 }
  0x3b   :  { %v435_v12 = vmul.f32 %v1969_v40, %v417_v3  ;;  %v303_v37 = vadd.f32 %v283_v32, %v243_v30  ;;  %v304_v38 = vadd.f32 %v284_v33, %v244_v31  ;;  %v380_v39 = vmul.f32 %v362_v27, %v326_v18 }
  0x3c   :  { %v436_v42 = vmul.f32 %v1973_v43, %v418_v34  ;;  %v450_v46 = vsub.f32 1.6, %v1979_v41  ;;  %v2020_v44 = vadd.f32 1.0, %v1872_v1  ;;  %vm131_vm10 = vcmp.ge.f32.partialorder %v1997_v7, 0.0 }
  0x3d   :  { %v483_v47 = vadd.f32 %v467_v62, %v435_v12  ;;  %v323_v48 = vmul.f32 2.5, %v303_v37  ;;  %v324_v49 = vmul.f32 2.5, %v304_v38  ;;  %v465_v50 = vmul.f32 %v449_v36, %v417_v3 }
  0x3e   :  { %v484_v51 = vadd.f32 %v468_v35, %v436_v42  ;;  %vm132_vm11 = vcmp.ge.f32.partialorder %v2020_v44, 0.0  ;;  %vm153_vm12 = vcmp.lt.f32.partialorder %v1997_v7, 0.4  ;;  %vm154_vm13 = vcmp.lt.f32.partialorder %v2020_v44, 0.4 }
  0x3f   :  { %v499_v40 = vmul.f32 0.8333333, %v483_v47  ;;  %v343_v43 = vmul.f32 %v1976_v45, %v323_v48  ;;  %v344_v52 = vmul.f32 %v1979_v41, %v324_v49  ;;  %vm175_vm14 = vmand %vm131_vm10, %vm153_vm12  ;;  %v261_v53 = vsub.f32 0.8, %v1997_v7 }
  0x40   :  { %v500_v54 = vmul.f32 0.8333333, %v484_v51  ;;  %v466_v55 = vmul.f32 %v450_v46, %v418_v34  ;;  %vm176_vm15 = vmand %vm132_vm11, %vm154_vm13  ;;  %v1583_v56 = vsel %vm175_vm14, 1.0, %v3102_v10  ;;  %v262_v57 = vsub.f32 0.8, %v2020_v44 }
  0x41   :  { %v397_v58 = vadd.f32 %v379_v11, %v343_v43  ;;  %v398_v59 = vadd.f32 %v380_v39, %v344_v52  ;;  %v1584_v60 = vsel %vm176_vm15, 1.0, %v3102_v10  ;;  %v241_v61 = vmul.f32 %v1583_v56, %v1997_v7 }
  0x42   :  { %v510_v63 = vpack.c.bf16 %v500_v54, %v499_v40  ;;  %v242_v6 = vmul.f32 %v1584_v60, %v2020_v44  ;;  %v281_v8 = vmul.f32 %v1585_v25, %v261_v53  ;;  %v282_v5 = vmul.f32 %v1586_v2, %v262_v57 }
  0x43   :  { %v415_v9 = vmul.f32 1.25, %v397_v58  ;;  %v416_v13 = vmul.f32 1.25, %v398_v59  ;;  %v359_v14 = vsub.f32 1.2, %v1997_v7  ;;  %v360_v15 = vsub.f32 1.2, %v2020_v44 }
  0x44   :  { %527 = vmatpush.bf16.msra.mxu0 %v510_v63  ;;  %v301_v16 = vadd.f32 %v281_v8, %v241_v61  ;;  %v302_v17 = vadd.f32 %v282_v5, %v242_v6  ;;  %v447_v18 = vsub.f32 1.6, %v1997_v7  ;;  %v448_v62 = vsub.f32 1.6, %v2020_v44 }
  0x45   :  { %v433_v19 = vmul.f32 %v1976_v45, %v415_v9  ;;  %v434_v20 = vmul.f32 %v1979_v41, %v416_v13  ;;  %v377_v4 = vmul.f32 %v359_v14, %v323_v48  ;;  %v378_v23 = vmul.f32 %v360_v15, %v324_v49 }
  0x46   :  { %v321_v21 = vmul.f32 2.5, %v301_v16  ;;  %v322_v22 = vmul.f32 2.5, %v302_v17  ;;  %v463_v24 = vmul.f32 %v447_v18, %v415_v9  ;;  %v2041_v27 = vadd.f32 1.4, %v1867_v0 }
  0x47   :  { %v481_v25 = vadd.f32 %v465_v50, %v433_v19  ;;  %v482_v26 = vadd.f32 %v466_v55, %v434_v20  ;;  %v2044_v28 = vadd.f32 1.4, %v1872_v1  ;;  %v464_v45 = vmul.f32 %v448_v62, %v416_v13 }
  0x48   :  { %v341_v29 = vmul.f32 %v1997_v7, %v321_v21  ;;  %v342_v2 = vmul.f32 %v2020_v44, %v322_v22  ;;  %v1553_v41 = vmul.f32 -1.442695, %v1867_v0  ;;  %vm129_vm0 = vcmp.ge.f32.partialorder %v2041_v27, 0.0 }
  0x49   :  { %v497_v30 = vmul.f32 0.8333333, %v481_v25  ;;  %v498_v3 = vmul.f32 0.8333333, %v482_v26  ;;  %vm130_vm8 = vcmp.ge.f32.partialorder %v2044_v28, 0.0 }
  0x4a   :  { %v395_v31 = vadd.f32 %v377_v4, %v341_v29  ;;  %v396_v32 = vadd.f32 %v378_v23, %v342_v2  ;;  %vm151_vm2 = vcmp.lt.f32.partialorder %v2041_v27, 0.4  ;;  %vm152_vm3 = vcmp.lt.f32.partialorder %v2044_v28, 0.4 }
  0x4b   :  { %v509_v33 = vpack.c.bf16 %v498_v3, %v497_v30  ;;  %vm173_vm5 = vmand %vm129_vm0, %vm151_vm2  ;;  %v259_v34 = vsub.f32 0.8, %v2041_v27  ;;  %v260_v35 = vsub.f32 0.8, %v2044_v28  ;;  %v1554_v11 = vmul.f32 -1.442695, %v1872_v1 }
  0x4c   :  { %v413_v36 = vmul.f32 1.25, %v395_v31  ;;  %v414_v12 = vmul.f32 1.25, %v396_v32  ;;  %vm174_vm6 = vmand %vm130_vm8, %vm152_vm3  ;;  %v2057_v37 = vsel %vm173_vm5, 1.0, %v3102_v10  ;;  %v357_v38 = vsub.f32 1.2, %v2041_v27 }
  0x4d   :  { %528 = vmatpush.bf16.msra.mxu0 %v509_v33  ;;  %v2061_v39 = vsel %vm174_vm6, 1.0, %v3102_v10  ;;  %v239_v42 = vmul.f32 %v2057_v37, %v2041_v27  ;;  %v279_v46 = vmul.f32 %v1583_v56, %v259_v34  ;;  %v280_v47 = vmul.f32 %v1584_v60, %v260_v35 }
  0x4e   :  { %v431_v48 = vmul.f32 %v1997_v7, %v413_v36  ;;  %v432_v49 = vmul.f32 %v2020_v44, %v414_v12  ;;  %v240_v50 = vmul.f32 %v2061_v39, %v2044_v28  ;;  %v358_v51 = vsub.f32 1.2, %v2044_v28 }
  0x4f   :  { %v299_v40 = vadd.f32 %v279_v46, %v239_v42  ;;  %v445_v43 = vsub.f32 1.6, %v2041_v27  ;;  %v446_v52 = vsub.f32 1.6, %v2044_v28  ;;  %1720 = vpow2.f32 %v1553_v41 }
  0x50   :  { %v479_v53 = vadd.f32 %v463_v24, %v431_v48  ;;  %v480_v54 = vadd.f32 %v464_v45, %v432_v49  ;;  %v300_v55 = vadd.f32 %v280_v47, %v240_v50  ;;  %v375_v57 = vmul.f32 %v357_v38, %v321_v21 }
  0x51   :  { %v319_v56 = vmul.f32 2.5, %v299_v40  ;;  %1722 = vpow2.f32 %v1554_v11  ;;  %v376_v59 = vmul.f32 %v358_v51, %v322_v22  ;;  %v2076_v61 = vadd.f32 1.8, %v1867_v0 }
  0x52   :  { %v495_v7 = vmul.f32 0.8333333, %v479_v53  ;;  %v496_v58 = vmul.f32 0.8333333, %v480_v54  ;;  %v2072_v44 = vmul.f32 2.5, %v300_v55  ;;  %v461_v5 = vmul.f32 %v445_v43, %v413_v36 }
  0x53   :  { %v339_v60 = vmul.f32 %v2041_v27, %v319_v56  ;;  %v2079_v63 = vadd.f32 1.8, %v1872_v1  ;;  %v462_v9 = vmul.f32 %v446_v52, %v414_v12  ;;  %vm127_vm9 = vcmp.ge.f32.partialorder %v2076_v61, 0.0 }
  0x54   :  { %v508_v6 = vpack.c.bf16 %v496_v58, %v495_v7  ;;  %v340_v8 = vmul.f32 %v2044_v28, %v2072_v44  ;;  %vm149_vm1 = vcmp.lt.f32.partialorder %v2076_v61, 0.4  ;;  %v2088_v16 = vadd.f32 2.2, %v1867_v0  ;;  %v1711_v58 = vld [vmem:[%s3089_s1 + $0x8] sm:$0xff] }
  0x55   :  { %v393_v13 = vadd.f32 %v375_v57, %v339_v60  ;;  %vm128_vm4 = vcmp.ge.f32.partialorder %v2079_v63, 0.0  ;;  %v1721_v14 = vpop.eup %1720  ;;  %vm150_vm7 = vcmp.lt.f32.partialorder %v2079_v63, 0.4  ;;  %vm171_vm10 = vmand %vm127_vm9, %vm149_vm1  ;;  %v2091_v17 = vadd.f32 2.2, %v1872_v1 }
  0x56   :  { %529 = vmatpush.bf16.msra.mxu0 %v508_v6  ;;  %v394_v15 = vadd.f32 %v376_v59, %v340_v8  ;;  %v68_v19 = vadd.f32 1.0, %v1721_v14  ;;  %vm172_vm11 = vmand %vm128_vm4, %vm150_vm7  ;;  %v2094_v20 = vsel %vm171_vm10, 1.0, %v3102_v10  ;;  %v257_v4 = vsub.f32 0.8, %v2076_v61 }
  0x57   :  { %v1723_v18 = vpop.eup %1722  ;;  %v411_v62 = vmul.f32 1.25, %v393_v13  ;;  %v258_v23 = vsub.f32 0.8, %v2079_v63  ;;  %v355_v24 = vsub.f32 1.2, %v2076_v61  ;;  %v2103_v26 = vsel %vm172_vm11, 1.0, %v3102_v10 }
  0x58   :  { %v412_v21 = vmul.f32 1.25, %v394_v15  ;;  %v2097_v22 = vadd.f32 1.0, %v1723_v18  ;;  %1724 = vrcp.f32 %v68_v19  ;;  %v237_v29 = vmul.f32 %v2094_v20, %v2076_v61 }
  0x59   :  { %v429_v25 = vmul.f32 %v2041_v27, %v411_v62  ;;  %v79_v45 = vand.u32 2147483647, %v68_v19  ;;  %v81_v41 = vand.u32 2147483648, %v68_v19  ;;  %vm75_vm12 = vweird.f32 %v68_v19 }
  0x5a   :  { %v430_v2 = vmul.f32 %v2044_v28, %v412_v21  ;;  %1726 = vrcp.f32 %v2097_v22  ;;  %v94_v3 = vand.u32 2147483647, %v2097_v22  ;;  %v96_v31 = vand.u32 2147483648, %v2097_v22 }
  0x5b   :  { %v477_v30 = vadd.f32 %v461_v5, %v429_v25  ;;  %vm90_vm13 = vweird.f32 %v2097_v22  ;;  %v238_v32 = vmul.f32 %v2103_v26, %v2079_v63  ;;  %v277_v33 = vmul.f32 %v2057_v37, %v257_v4 }
  0x5c   :  { %v478_v27 = vadd.f32 %v462_v9, %v430_v2  ;;  %v82_v28 = vor.u32 1.1754944e-38, %v81_v41  ;;  %v97_v35 = vor.u32 1.1754944e-38, %v96_v31  ;;  %v278_v11 = vmul.f32 %v2061_v39, %v258_v23 }
  0x5d   :  { %v493_v34 = vmul.f32 0.8333333, %v477_v30  ;;  %vm2116_vm14 = vcmp.eq.f32.partialorder %v79_v45, 8.507059e+37  ;;  %v297_v38 = vadd.f32 %v277_v33, %v237_v29  ;;  %v356_v42 = vsub.f32 1.2, %v2079_v63 }
  0x5e   :  { %v494_v36 = vmul.f32 0.8333333, %v478_v27  ;;  %v373_v46 = vmul.f32 %v355_v24, %v319_v56  ;;  %v1725_v47 = vpop.eup %1724  ;;  %vm2121_vm15 = vcmp.eq.f32.partialorder %v94_v3, 8.507059e+37  ;;  %v298_v37 = vadd.f32 %v278_v11, %v238_v32 }
  0x5f   :  { %v443_v49 = vsub.f32 1.6, %v2076_v61  ;;  %v444_v50 = vsub.f32 1.6, %v2079_v63  ;;  %vm125_vm0 = vcmp.ge.f32.partialorder %v2088_v16, 0.0  ;;  %v71_v40 = vmul.f32 %v1725_v47, %v68_v19 }
  0x60   :  { %v1727_v39 = vpop.eup %1726  ;;  %v507_v51 = vpack.c.bf16 %v494_v36, %v493_v34  ;;  %vm76_vm8 = vweird.f32 %v1725_v47  ;;  %v317_v43 = vmul.f32 2.5, %v297_v38  ;;  %v318_v53 = vmul.f32 2.5, %v298_v37 }
  0x61   :  { %v86_v52 = vmul.f32 %v1727_v39, %v2097_v22  ;;  %vm91_vm2 = vweird.f32 %v1727_v39  ;;  %v374_v54 = vmul.f32 %v356_v42, %v2072_v44  ;;  %v72_v55 = vsub.f32 1.0, %v71_v40  ;;  %vm2132_vm3 = vmor %vm75_vm12, %vm76_vm8 }
  0x62   :  { %530 = vmatpush.bf16.msra.mxu0 %v507_v51  ;;  %v337_v56 = vmul.f32 %v2076_v61, %v317_v43  ;;  %v459_v57 = vmul.f32 %v443_v49, %v411_v62  ;;  %v460_v7 = vmul.f32 %v444_v50, %v412_v21  ;;  %v338_v60 = vmul.f32 %v2079_v63, %v318_v53  ;;  %vm2148_vm7 = vmor %vm90_vm13, %vm91_vm2 }
  0x63   :  { %v87_v59 = vsub.f32 1.0, %v86_v52  ;;  %vm126_vm5 = vcmp.ge.f32.partialorder %v2091_v17, 0.0  ;;  %vm147_vm6 = vcmp.lt.f32.partialorder %v2088_v16, 0.4  ;;  %v73_v6 = vmul.f32 %v1725_v47, %v72_v55 }
  0x64   :  { %v391_v44 = vadd.f32 %v373_v46, %v337_v56  ;;  %vm148_vm9 = vcmp.lt.f32.partialorder %v2091_v17, 0.4  ;;  %vm169_vm4 = vmand %vm125_vm0, %vm147_vm6  ;;  %v255_v8 = vsub.f32 0.8, %v2088_v16  ;;  %v392_v9 = vadd.f32 %v374_v54, %v338_v60 }
  0x65   :  { %v88_v5 = vmul.f32 %v1727_v39, %v87_v59  ;;  %vm170_vm1 = vmand %vm126_vm5, %vm148_vm9  ;;  %v1577_v13 = vsel %vm169_vm4, 1.0, %v3102_v10  ;;  %v256_v14 = vsub.f32 0.8, %v2091_v17  ;;  %v74_v15 = vadd.f32 %v1725_v47, %v73_v6  ;;  %v1713_v59 = vld [vmem:[#allocation2 + $0x8] sm:$0xff] }
  0x66   :  { %v409_v62 = vmul.f32 1.25, %v391_v44  ;;  %v1578_v19 = vsel %vm170_vm1, 1.0, %v3102_v10  ;;  %v235_v4 = vmul.f32 %v1577_v13, %v2088_v16  ;;  %v410_v23 = vmul.f32 1.25, %v392_v9 }
  0x67   :  { %v89_v21 = vadd.f32 %v1727_v39, %v88_v5  ;;  %v236_v24 = vmul.f32 %v1578_v19, %v2091_v17  ;;  %v275_v25 = vmul.f32 %v2094_v20, %v255_v8  ;;  %v78_v29 = vsel %vm2132_vm3, %v1725_v47, %v74_v15 }
  0x68   :  { %v427_v22 = vmul.f32 %v2076_v61, %v409_v62  ;;  %v276_v2 = vmul.f32 %v2103_v26, %v256_v14  ;;  %v353_v45 = vsub.f32 1.2, %v2088_v16  ;;  %v83_v41 = vsel %vm2116_vm14, %v82_v28, %v78_v29 }
  0x69   :  { %v93_v30 = vsel %vm2148_vm7, %v1727_v39, %v89_v21  ;;  %v428_v3 = vmul.f32 %v2079_v63, %v410_v23  ;;  %v295_v31 = vadd.f32 %v275_v25, %v235_v4  ;;  %v100_v27 = vmul.f32 %v83_v41, %v1867_v0  ;;  %v1710_v0 = vld [vmem:[%s3089_s1] sm:$0xff] }
  0x6a   :  { %v98_v20 = vsel %vm2121_vm15, %v97_v35, %v93_v30  ;;  %v475_v32 = vadd.f32 %v459_v57, %v427_v22  ;;  %v296_v61 = vadd.f32 %v276_v2, %v236_v24  ;;  %v354_v11 = vsub.f32 1.2, %v2091_v17 }
  0x6b   :  { %v101_v26 = vmul.f32 %v98_v20, %v1872_v1  ;;  %v476_v33 = vadd.f32 %v460_v7, %v428_v3  ;;  %v315_v34 = vmul.f32 2.5, %v295_v31  ;;  %v371_v12 = vmul.f32 %v353_v45, %v317_v43  ;;  %v1712_v7 = vld [vmem:[#allocation2] sm:$0xff] }
  0x6c   :  { %v491_v28 = vmul.f32 0.8333333, %v475_v32  ;;  %v316_v36 = vmul.f32 2.5, %v296_v61  ;;  %v441_v38 = vsub.f32 1.6, %v2088_v16  ;;  %v372_v35 = vmul.f32 %v354_v11, %v318_v53 }
  0x6d   :  { %v102_v63 = vpack.c.bf16 %v101_v26, %v100_v27  ;;  %v492_v42 = vmul.f32 0.8333333, %v476_v33  ;;  %v335_v46 = vmul.f32 %v2088_v16, %v315_v34  ;;  %v442_v47 = vsub.f32 1.6, %v2091_v17 }
  0x6e   :  { %v336_v1 = vmul.f32 %v2091_v17, %v316_v36  ;;  %vm554_vm10 = vcmask 130048   ;;  %v457_v39 = vmul.f32 %v441_v38, %v409_v62 }
  0x6f   :  { %568 = vmatpush.bf16.msra.mxu1 %v102_v63  ;;  %v506_v48 = vpack.c.bf16 %v492_v42, %v491_v28  ;;  %v389_v37 = vadd.f32 %v371_v12, %v335_v46  ;;  %v458_v40 = vmul.f32 %v442_v47, %v410_v23 }
  0x70   :  { %v390_v49 = vadd.f32 %v372_v35, %v336_v1 }
  0x71   :  { %531 = vmatpush.bf16.msra.mxu0 %v506_v48  ;;  %v407_v50 = vmul.f32 1.25, %v389_v37 }
  0x72   :  { %1615 = vmatmul.msk.bf16.vlgmr.msra.gmra.mxu1 %vm554_vm10, %v1710_v0  ;;  %v408_v51 = vmul.f32 1.25, %v390_v49 }
  0x73   :  { %v425_v43 = vmul.f32 %v2088_v16, %v407_v50 }
  0x74   :  { %v426_v52 = vmul.f32 %v2091_v17, %v408_v51 }
  0x75   :  { %v473_v53 = vadd.f32 %v457_v39, %v425_v43 }
  0x76   :  { %v474_v54 = vadd.f32 %v458_v40, %v426_v52 }
  0x77   :  { %v489_v55 = vmul.f32 0.8333333, %v473_v53 }
  0x78   :  { %v490_v56 = vmul.f32 0.8333333, %v474_v54 }
  0x7a   :  { %v505_v57 = vpack.c.bf16 %v490_v56, %v489_v55 }
  0x7c   :  { %532 = vmatpush.bf16.msra.mxu0 %v505_v57 }
  0x7f   :  { %533 = vmatmul.bf16.vlgmr.msra.gmra.mxu0 %v1712_v7 }
  0x82   :  { %1616 = vmatmul.msk.bf16.gmra.mxu1 %vm554_vm10, %v1711_v58 }
  0x8f   :  { %538 = vmatmul.bf16.gmra.mxu0 %v1713_v59 }
  0xef   :  { %v570_v60 = vpop.f32.mrf.mxu1 }
  0xf7   :  { %v572_v17 = vpop.f32.mrf.mxu1 }
  0xfc   :  { %v534_v16 = vpop.f32.mrf.mxu0 }
  0xfd   :  { %v2185_v6 = vadd.f32 %v570_v60, %v534_v16 }
  0xff   :  { %v575_v5 = vpop.f32.mrf.mxu1  ;;  %v2192_v14 = vadd.f32 0.6, %v2185_v6  ;;  %v2195_v15 = vadd.f32 0.2, %v2185_v6  ;;  %v2198_v18 = vadd.f32 -0.2, %v2185_v6 }
 0x100   :  { %v2219_v25 = vadd.f32 1.0, %v2185_v6 }
 0x101   :  { %3142 = vst [vmem:[#allocation11_spill] sm:$0xff] %v2192_v14 }
 0x102   :  { %3143 = vst [vmem:[#allocation12_spill] sm:$0xff] %v2195_v15 }
 0x104   :  { %v536_v44 = vpop.f32.mrf.mxu0 }
 0x105   :  { %v2187_v8 = vadd.f32 %v572_v17, %v536_v44 }
 0x107   :  { %v2201_v62 = vadd.f32 0.6, %v2187_v8  ;;  %v2204_v19 = vadd.f32 0.2, %v2187_v8  ;;  %v2207_v4 = vadd.f32 -0.2, %v2187_v8  ;;  %v577_v31 = vpop.f32.mrf.mxu1 }
 0x108   :  { %v2238_v45 = vadd.f32 1.0, %v2187_v8 }
 0x109   :  { %3144 = vst [vmem:[#allocation13_spill] sm:$0xff] %v2201_v62 }
 0x10a   :  { %3145 = vst [vmem:[#allocation14_spill] sm:$0xff] %v2204_v19 }
 0x10b   :  { %3146 = vst [vmem:[#allocation15_spill] sm:$0xff] %v2207_v4 }
 0x10c   :  { %v539_v9 = vpop.f32.mrf.mxu0 }
 0x10d   :  { %v2189_v13 = vadd.f32 %v575_v5, %v539_v9 }
 0x10f   :  { %v2210_v21 = vadd.f32 1.0, %v2189_v13  ;;  %v2213_v23 = vadd.f32 0.6, %v2189_v13  ;;  %v2216_v24 = vadd.f32 0.2, %v2189_v13  ;;  %v2246_v3 = vadd.f32 -1.0, %v2189_v13 }
 0x110   :  { %v2222_v29 = vadd.f32 -0.2, %v2189_v13  ;;  %v2225_v22 = vadd.f32 -0.6, %v2189_v13  ;;  %v2228_v2 = vadd.f32 -1.4, %v2189_v13 }
 0x111   :  { %3147 = vst [vmem:[#allocation16_spill] sm:$0xff] %v2213_v23  ;;  %vm722_vm11 = vcmp.ge.f32.partialorder %v2210_v21, 0.0  ;;  %vm726_vm12 = vcmp.ge.f32.partialorder %v2213_v23, 0.0  ;;  %vm730_vm13 = vcmp.ge.f32.partialorder %v2216_v24, 0.0  ;;  %vm766_vm14 = vcmp.lt.f32.partialorder %v2210_v21, 0.4 }
 0x112   :  { %3148 = vst [vmem:[#allocation17_spill] sm:$0xff] %v2216_v24  ;;  %vm734_vm15 = vcmp.ge.f32.partialorder %v2222_v29, 0.0  ;;  %vm770_vm0 = vcmp.lt.f32.partialorder %v2213_v23, 0.4  ;;  %vm774_vm8 = vcmp.lt.f32.partialorder %v2216_v24, 0.4  ;;  %vm810_vm2 = vmand %vm722_vm11, %vm766_vm14 }
 0x113   :  { %vm778_vm3 = vcmp.lt.f32.partialorder %v2222_v29, 0.4  ;;  %vm814_vm5 = vmand %vm726_vm12, %vm770_vm0  ;;  %v2242_v41 = vsel %vm810_vm2, 1.0, %v3102_v10  ;;  %v982_v30 = vsub.f32 0.8, %v2210_v21 }
 0x114   :  { %v541_v20 = vpop.f32.mrf.mxu0  ;;  %vm818_vm6 = vmand %vm730_vm13, %vm774_vm8  ;;  %v1683_v27 = vsel %vm814_vm5, 1.0, %v3102_v10  ;;  %v942_v32 = vmul.f32 %v2242_v41, %v2210_v21  ;;  %v986_v61 = vsub.f32 0.8, %v2213_v23  ;;  %v990_v26 = vsub.f32 0.8, %v2216_v24 }
 0x115   :  { %v2253_v33 = vadd.f32 %v577_v31, %v541_v20  ;;  %vm822_vm9 = vmand %vm734_vm15, %vm778_vm3  ;;  %v1687_v34 = vsel %vm818_vm6, 1.0, %v3102_v10  ;;  %v946_v11 = vmul.f32 %v1683_v27, %v2213_v23  ;;  %v1022_v28 = vmul.f32 %v1683_v27, %v982_v30 }
 0x116   :  { %v2260_v36 = vsel %vm822_vm9, 1.0, %v3102_v10  ;;  %v950_v12 = vmul.f32 %v1687_v34, %v2216_v24  ;;  %v1026_v38 = vmul.f32 %v1687_v34, %v986_v61  ;;  %v1178_v63 = vsub.f32 1.2, %v2210_v21 }
 0x117   :  { %v2265_v42 = vadd.f32 1.0, %v2253_v33  ;;  %v2268_v46 = vadd.f32 0.6, %v2253_v33  ;;  %v2271_v35 = vadd.f32 0.2, %v2253_v33  ;;  %v1030_v0 = vmul.f32 %v2260_v36, %v990_v26 }
 0x118   :  { %v2275_v1 = vadd.f32 -0.2, %v2253_v33  ;;  %v1062_v47 = vadd.f32 %v1022_v28, %v942_v32  ;;  %v1066_v48 = vadd.f32 %v1026_v38, %v946_v11  ;;  %v1182_v37 = vsub.f32 1.2, %v2213_v23 }
 0x119   :  { %3149 = vst [vmem:[#allocation18_spill] sm:$0xff] %v2268_v46  ;;  %vm723_vm4 = vcmp.ge.f32.partialorder %v2265_v42, 0.0  ;;  %vm727_vm1 = vcmp.ge.f32.partialorder %v2268_v46, 0.0  ;;  %vm731_vm7 = vcmp.ge.f32.partialorder %v2271_v35, 0.0  ;;  %vm767_vm10 = vcmp.lt.f32.partialorder %v2265_v42, 0.4 }
 0x11a   :  { %3150 = vst [vmem:[#allocation19_spill] sm:$0xff] %v2271_v35  ;;  %vm735_vm11 = vcmp.ge.f32.partialorder %v2275_v1, 0.0  ;;  %vm771_vm12 = vcmp.lt.f32.partialorder %v2268_v46, 0.4  ;;  %vm775_vm13 = vcmp.lt.f32.partialorder %v2271_v35, 0.4  ;;  %vm811_vm14 = vmand %vm723_vm4, %vm767_vm10  ;;  %v1070_v49 = vadd.f32 %v1030_v0, %v950_v12 }
 0x11b   :  { %vm779_vm15 = vcmp.lt.f32.partialorder %v2275_v1, 0.4  ;;  %vm815_vm0 = vmand %vm727_vm1, %vm771_vm12  ;;  %v2287_v50 = vsel %vm811_vm14, 1.0, %v3102_v10  ;;  %v983_v39 = vsub.f32 0.8, %v2265_v42  ;;  %v2290_v51 = vmul.f32 2.5, %v1062_v47 }
 0x11c   :  { %vm819_vm8 = vmand %vm731_vm7, %vm775_vm13  ;;  %v1684_v40 = vsel %vm815_vm0, 1.0, %v3102_v10  ;;  %v943_v43 = vmul.f32 %v2287_v50, %v2265_v42  ;;  %v987_v52 = vsub.f32 0.8, %v2268_v46  ;;  %v991_v53 = vsub.f32 0.8, %v2271_v35 }
 0x11d   :  { %vm823_vm2 = vmand %vm735_vm11, %vm779_vm15  ;;  %v1688_v54 = vsel %vm819_vm8, 1.0, %v3102_v10  ;;  %v947_v55 = vmul.f32 %v1684_v40, %v2268_v46  ;;  %v1023_v56 = vmul.f32 %v1684_v40, %v983_v39  ;;  %v1106_v57 = vmul.f32 2.5, %v1066_v48 }
 0x11e   :  { %v2302_v7 = vsel %vm823_vm2, 1.0, %v3102_v10  ;;  %v951_v58 = vmul.f32 %v1688_v54, %v2271_v35  ;;  %v1027_v59 = vmul.f32 %v1688_v54, %v987_v52  ;;  %v2305_v60 = vmul.f32 2.5, %v1070_v49 }
 0x11f   :  { %vm738_vm3 = vcmp.ge.f32.partialorder %v2225_v22, 0.0  ;;  %v1031_v16 = vmul.f32 %v2302_v7, %v991_v53  ;;  %v1063_v17 = vadd.f32 %v1023_v56, %v943_v43  ;;  %v1142_v44 = vmul.f32 %v2210_v21, %v2290_v51 }
 0x120   :  { %3151 = vst [vmem:[#allocation20_spill] sm:$0xff] %v2305_v60  ;;  %v1146_v5 = vmul.f32 %v2213_v23, %v1106_v57  ;;  %v1067_v9 = vadd.f32 %v1027_v59, %v947_v55  ;;  %v1179_v30 = vsub.f32 1.2, %v2265_v42  ;;  %v1183_v31 = vsub.f32 1.2, %v2268_v46 }
 0x121   :  { %v1214_v20 = vmul.f32 %v1178_v63, %v1106_v57  ;;  %vm742_vm5 = vcmp.ge.f32.partialorder %v2246_v3, 0.0  ;;  %v1071_v27 = vadd.f32 %v1031_v16, %v951_v58  ;;  %v2315_v32 = vmul.f32 2.5, %v1063_v17 }
 0x122   :  { %v1218_v61 = vmul.f32 %v1182_v37, %v2305_v60  ;;  %v1354_v26 = vsub.f32 1.6, %v2210_v21  ;;  %v1107_v34 = vmul.f32 2.5, %v1067_v9  ;;  %v1355_v28 = vsub.f32 1.6, %v2265_v42 }
 0x123   :  { %v1250_v11 = vadd.f32 %v1214_v20, %v1142_v44  ;;  %v2321_v12 = vadd.f32 -0.6, %v2253_v33  ;;  %v2323_v38 = vmul.f32 2.5, %v1071_v27  ;;  %v1143_v63 = vmul.f32 %v2265_v42, %v2315_v32 }
 0x124   :  { %v1254_v0 = vadd.f32 %v1218_v61, %v1146_v5  ;;  %v2328_v47 = vadd.f32 -1.0, %v2253_v33  ;;  %v1147_v48 = vmul.f32 %v2268_v46, %v1107_v34  ;;  %v1215_v37 = vmul.f32 %v1179_v30, %v1107_v34 }
 0x125   :  { %3152 = vst [vmem:[#allocation21_spill] sm:$0xff] %v2323_v38  ;;  %v2331_v49 = vmul.f32 1.25, %v1250_v11  ;;  %v2334_v39 = vadd.f32 -1.4, %v2253_v33  ;;  %v1219_v40 = vmul.f32 %v1183_v31, %v2323_v38  ;;  %v1663_v52 = vadd.f32 -1.8, %v2189_v13 }
 0x126   :  { %v2337_v43 = vmul.f32 1.25, %v1254_v0  ;;  %v1664_v53 = vadd.f32 -1.8, %v2253_v33  ;;  %v1251_v54 = vadd.f32 %v1215_v37, %v1143_v63  ;;  %vm739_vm6 = vcmp.ge.f32.partialorder %v2321_v12, 0.0 }
 0x127   :  { %v1322_v55 = vmul.f32 %v2210_v21, %v2331_v49  ;;  %vm743_vm9 = vcmp.ge.f32.partialorder %v2328_v47, 0.0  ;;  %v1255_v56 = vadd.f32 %v1219_v40, %v1147_v48  ;;  %vm746_vm4 = vcmp.ge.f32.partialorder %v2228_v2, 0.0 }
 0x128   :  { %3153 = vst [vmem:[#allocation22_spill] sm:$0xff] %v2337_v43  ;;  %v1386_v57 = vmul.f32 %v1354_v26, %v2337_v43  ;;  %vm747_vm1 = vcmp.ge.f32.partialorder %v2334_v39, 0.0  ;;  %v2348_v58 = vmul.f32 1.25, %v1251_v54  ;;  %vm782_vm11 = vcmp.lt.f32.partialorder %v2225_v22, 0.4 }
 0x129   :  { %v2351_v59 = vmul.f32 1.25, %v1255_v56  ;;  %vm783_vm12 = vcmp.lt.f32.partialorder %v2321_v12, 0.4  ;;  %vm786_vm13 = vcmp.lt.f32.partialorder %v2246_v3, 0.4  ;;  %vm826_vm14 = vmand %vm738_vm3, %vm782_vm11 }
 0x12a   :  { %v1418_v21 = vadd.f32 %v1386_v57, %v1322_v55  ;;  %v1323_v16 = vmul.f32 %v2265_v42, %v2348_v58  ;;  %vm787_vm15 = vcmp.lt.f32.partialorder %v2328_v47, 0.4  ;;  %vm790_vm0 = vcmp.lt.f32.partialorder %v2228_v2, 0.4  ;;  %vm827_vm2 = vmand %vm739_vm6, %vm783_vm12 }
 0x12b   :  { %3154 = vst [vmem:[#allocation23_spill] sm:$0xff] %v2351_v59  ;;  %vm791_vm8 = vcmp.lt.f32.partialorder %v2334_v39, 0.4  ;;  %v1387_v17 = vmul.f32 %v1355_v28, %v2351_v59  ;;  %vm794_vm10 = vcmp.lt.f32.partialorder %v1663_v52, 0.4  ;;  %vm830_vm3 = vmand %vm742_vm5, %vm786_vm13  ;;  %v2370_v42 = vsel %vm826_vm14, 1.0, %v3102_v10 }
 0x12c   :  { %v1450_v44 = vmul.f32 0.8333333, %v1418_v21  ;;  %vm795_vm7 = vcmp.lt.f32.partialorder %v1664_v53, 0.4  ;;  %vm831_vm11 = vmand %vm743_vm9, %vm787_vm15  ;;  %v2373_v5 = vsel %vm827_vm2, 1.0, %v3102_v10  ;;  %v1699_v9 = vsel %vm830_vm3, 1.0, %v3102_v10 }
 0x12d   :  { %v998_v30 = vsub.f32 0.8, %v2225_v22  ;;  %v1419_v31 = vadd.f32 %v1387_v17, %v1323_v16  ;;  %vm834_vm6 = vmand %vm746_vm4, %vm790_vm0  ;;  %v1700_v20 = vsel %vm831_vm11, 1.0, %v3102_v10  ;;  %v958_v27 = vmul.f32 %v2370_v42, %v2225_v22 }
 0x12e   :  { %v959_v61 = vmul.f32 %v2373_v5, %v2321_v12  ;;  %vm835_vm5 = vmand %vm747_vm1, %vm791_vm8  ;;  %v1703_v26 = vsel %vm834_vm6, 1.0, %v3102_v10  ;;  %v962_v34 = vmul.f32 %v1699_v9, %v2246_v3  ;;  %v963_v11 = vmul.f32 %v1700_v20, %v2328_v47 }
 0x12f   :  { %v999_v28 = vsub.f32 0.8, %v2321_v12  ;;  %v1451_v63 = vmul.f32 0.8333333, %v1419_v31  ;;  %vm3155_vm9 = vcmp.ge.f32.partialorder %v1663_v52, 0.0  ;;  %v1704_v0 = vsel %vm835_vm5, 1.0, %v3102_v10 }
 0x130   :  { %vm838_vm4 = vmand %vm3155_vm9, %vm794_vm10  ;;  %v966_v48 = vmul.f32 %v1703_v26, %v2228_v2  ;;  %v1002_v37 = vsub.f32 0.8, %v2246_v3  ;;  %vm3156_vm1 = vcmp.ge.f32.partialorder %v1664_v53, 0.0  ;;  %v967_v54 = vmul.f32 %v1704_v0, %v2334_v39 }
 0x131   :  { %vm839_vm12 = vmand %vm3156_vm1, %vm795_vm7  ;;  %v1707_v40 = vsel %vm838_vm4, 1.0, %v3102_v10  ;;  %v1003_v55 = vsub.f32 0.8, %v2328_v47  ;;  %v1006_v56 = vsub.f32 0.8, %v2228_v2  ;;  %v1475_v57 = vpack.c.bf16 %v1451_v63, %v1450_v44 }
 0x132   :  { %v1708_v52 = vsel %vm839_vm12, 1.0, %v3102_v10  ;;  %v1007_v21 = vsub.f32 0.8, %v2334_v39  ;;  %v1038_v16 = vmul.f32 %v1699_v9, %v998_v30  ;;  %v1039_v17 = vmul.f32 %v1700_v20, %v999_v28 }
 0x133   :  { %v1042_v31 = vmul.f32 %v1703_v26, %v1002_v37  ;;  %v1043_v46 = vmul.f32 %v1704_v0, %v1003_v55  ;;  %v1046_v59 = vmul.f32 %v1707_v40, %v1006_v56  ;;  %vm720_vm7 = vcmp.ge.f32.partialorder %v2219_v25, 0.0  ;;  %1491 = vmatpush.bf16.msra.mxu2 %v1475_v57 }
 0x134   :  { %v1047_v53 = vmul.f32 %v1708_v52, %v1007_v21  ;;  %v1078_v23 = vadd.f32 %v1038_v16, %v958_v27  ;;  %v1194_v43 = vsub.f32 1.2, %v2225_v22  ;;  %v1195_v35 = vsub.f32 1.2, %v2321_v12 }
 0x135   :  { %v1079_v2 = vadd.f32 %v1039_v17, %v959_v61  ;;  %v1082_v44 = vadd.f32 %v1042_v31, %v962_v34  ;;  %v1083_v63 = vadd.f32 %v1043_v46, %v963_v11  ;;  %v1086_v10 = vadd.f32 %v1046_v59, %v966_v48 }
 0x136   :  { %v1087_v38 = vadd.f32 %v1047_v53, %v967_v54  ;;  %v2408_v39 = vmul.f32 2.5, %v1078_v23  ;;  %v1198_v9 = vsub.f32 1.2, %v2246_v3  ;;  %v1199_v30 = vsub.f32 1.2, %v2328_v47 }
 0x137   :  { %v2412_v20 = vmul.f32 2.5, %v1079_v2  ;;  %v1122_v26 = vmul.f32 2.5, %v1082_v44  ;;  %v1123_v28 = vmul.f32 2.5, %v1083_v63  ;;  %v1126_v27 = vmul.f32 2.5, %v1086_v10 }
 0x138   :  { %v1127_v0 = vmul.f32 2.5, %v1087_v38  ;;  %v1158_v37 = vmul.f32 %v2225_v22, %v2408_v39  ;;  %v1370_v61 = vsub.f32 1.6, %v2225_v22  ;;  %v1371_v46 = vsub.f32 1.6, %v2321_v12 }
 0x139   :  { %v1159_v23 = vmul.f32 %v2321_v12, %v2412_v20  ;;  %v1162_v59 = vmul.f32 %v2246_v3, %v1122_v26  ;;  %v1163_v34 = vmul.f32 %v2328_v47, %v1123_v28  ;;  %v1230_v11 = vmul.f32 %v1194_v43, %v1122_v26 }
 0x13a   :  { %v1231_v48 = vmul.f32 %v1195_v35, %v1123_v28  ;;  %v1234_v40 = vmul.f32 %v1198_v9, %v1126_v27  ;;  %v1235_v54 = vmul.f32 %v1199_v30, %v1127_v0  ;;  %vm721_vm10 = vcmp.ge.f32.partialorder %v2238_v45, 0.0 }
 0x13b   :  { %v1266_v10 = vadd.f32 %v1230_v11, %v1158_v37  ;;  %vm724_vm13 = vcmp.ge.f32.partialorder %v2192_v14, 0.0  ;;  %vm725_vm14 = vcmp.ge.f32.partialorder %v2201_v62, 0.0  ;;  %vm728_vm15 = vcmp.ge.f32.partialorder %v2195_v15, 0.0 }
 0x13c   :  { %v1267_v38 = vadd.f32 %v1231_v48, %v1159_v23  ;;  %v1270_v55 = vadd.f32 %v1234_v40, %v1162_v59  ;;  %v1271_v56 = vadd.f32 %v1235_v54, %v1163_v34  ;;  %vm729_vm0 = vcmp.ge.f32.partialorder %v2204_v19, 0.0 }
 0x13d   :  { %v2427_v3 = vmul.f32 1.25, %v1266_v10  ;;  %vm764_vm3 = vcmp.lt.f32.partialorder %v2219_v25, 0.4  ;;  %vm765_vm11 = vcmp.lt.f32.partialorder %v2238_v45, 0.4 }
 0x13e   :  { %v2432_v35 = vmul.f32 1.25, %v1267_v38  ;;  %v1306_v47 = vmul.f32 1.25, %v1270_v55  ;;  %v1307_v43 = vmul.f32 1.25, %v1271_v56  ;;  %vm808_vm6 = vmand %vm720_vm7, %vm764_vm3  ;;  %vm768_vm5 = vcmp.lt.f32.partialorder %v2192_v14, 0.4 }
 0x13f   :  { %v1338_v57 = vmul.f32 %v2225_v22, %v2427_v3  ;;  %vm769_vm9 = vcmp.lt.f32.partialorder %v2201_v62, 0.4  ;;  %vm772_vm4 = vcmp.lt.f32.partialorder %v2195_v15, 0.4  ;;  %vm809_vm1 = vmand %vm721_vm10, %vm765_vm11  ;;  %vm773_vm12 = vcmp.lt.f32.partialorder %v2204_v19, 0.4 }
 0x140   :  { %v1339_v52 = vmul.f32 %v2321_v12, %v2432_v35  ;;  %v1402_v21 = vmul.f32 %v1370_v61, %v1306_v47  ;;  %v1403_v16 = vmul.f32 %v1371_v46, %v1307_v43  ;;  %vm812_vm7 = vmand %vm724_vm13, %vm768_vm5  ;;  %vm776_vm3 = vcmp.lt.f32.partialorder %v2198_v18, 0.4 }
 0x141   :  { %vm777_vm2 = vcmp.lt.f32.partialorder %v2207_v4, 0.4  ;;  %vm813_vm8 = vmand %vm725_vm14, %vm769_vm9  ;;  %v3157_v22 = vmov 0.0   ;;  %vm3158_vm14 = vcmp.ge.f32.partialorder %v2198_v18, 0.0  ;;  %v980_v59 = vsub.f32 0.8, %v2219_v25 }
 0x142   :  { %v2454_v17 = vsel %vm808_vm6, 1.0, %v3157_v22  ;;  %v2457_v31 = vsel %vm809_vm1, 1.0, %v3157_v22  ;;  %v1434_v12 = vadd.f32 %v1402_v21, %v1338_v57  ;;  %v1435_v53 = vadd.f32 %v1403_v16, %v1339_v52  ;;  %vm816_vm10 = vmand %vm728_vm15, %vm772_vm4 }
 0x143   :  { %v1681_v2 = vsel %vm812_vm7, 1.0, %v3157_v22  ;;  %v1682_v44 = vsel %vm813_vm8, 1.0, %v3157_v22  ;;  %vm817_vm13 = vmand %vm729_vm0, %vm773_vm12  ;;  %v1685_v63 = vsel %vm816_vm10, 1.0, %v3157_v22  ;;  %v940_v9 = vmul.f32 %v2454_v17, %v2219_v25 }
 0x144   :  { %v941_v30 = vmul.f32 %v2457_v31, %v2238_v45  ;;  %v944_v26 = vmul.f32 %v1681_v2, %v2192_v14  ;;  %v1466_v28 = vmul.f32 0.8333333, %v1434_v12  ;;  %v1467_v27 = vmul.f32 0.8333333, %v1435_v53  ;;  %vm820_vm15 = vmand %vm3158_vm14, %vm776_vm3 }
 0x145   :  { %v1686_v0 = vsel %vm817_vm13, 1.0, %v3157_v22  ;;  %v945_v37 = vmul.f32 %v1682_v44, %v2201_v62  ;;  %vm3159_vm0 = vcmp.ge.f32.partialorder %v2207_v4, 0.0  ;;  %v2482_v61 = vsel %vm820_vm15, 1.0, %v3157_v22 }
 0x146   :  { %vm821_vm8 = vmand %vm3159_vm0, %vm777_vm2  ;;  %v948_v46 = vmul.f32 %v1685_v63, %v2195_v15  ;;  %v949_v23 = vmul.f32 %v1686_v0, %v2204_v19  ;;  %v1483_v34 = vpack.c.bf16 %v1467_v27, %v1466_v28  ;;  %v981_v48 = vsub.f32 0.8, %v2238_v45 }
 0x147   :  { %v2488_v11 = vsel %vm821_vm8, 1.0, %v3157_v22  ;;  %v984_v40 = vsub.f32 0.8, %v2192_v14  ;;  %v985_v54 = vsub.f32 0.8, %v2201_v62  ;;  %v1020_v55 = vmul.f32 %v1681_v2, %v980_v59 }
 0x148   :  { %3160 = vst [vmem:[#allocation24_spill] sm:$0xff] %v2488_v11  ;;  %v988_v10 = vsub.f32 0.8, %v2195_v15  ;;  %v989_v38 = vsub.f32 0.8, %v2204_v19  ;;  %1504 = vmatpush.bf16.msra.mxu3 %v1483_v34  ;;  %v1021_v56 = vmul.f32 %v1682_v44, %v981_v48 }
 0x149   :  { %v1024_v47 = vmul.f32 %v1685_v63, %v984_v40  ;;  %v1176_v43 = vsub.f32 1.2, %v2219_v25  ;;  %v1177_v57 = vsub.f32 1.2, %v2238_v45  ;;  %v1025_v52 = vmul.f32 %v1686_v0, %v985_v54 }
 0x14a   :  { %v1028_v21 = vmul.f32 %v2482_v61, %v988_v10  ;;  %v1029_v16 = vmul.f32 %v2488_v11, %v989_v38  ;;  %v1060_v12 = vadd.f32 %v1020_v55, %v940_v9  ;;  %v1061_v53 = vadd.f32 %v1021_v56, %v941_v30 }
 0x14b   :  { %v1064_v28 = vadd.f32 %v1024_v47, %v944_v26  ;;  %v1180_v27 = vsub.f32 1.2, %v2192_v14  ;;  %v1181_v19 = vsub.f32 1.2, %v2201_v62  ;;  %v1065_v2 = vadd.f32 %v1025_v52, %v945_v37 }
 0x14c   :  { %v1068_v59 = vadd.f32 %v1028_v21, %v948_v46  ;;  %v1069_v44 = vadd.f32 %v1029_v16, %v949_v23  ;;  %v2501_v63 = vmul.f32 2.5, %v1060_v12  ;;  %v2503_v34 = vmul.f32 2.5, %v1061_v53 }
 0x14d   :  { %v1104_v48 = vmul.f32 2.5, %v1064_v28  ;;  %v1352_v0 = vsub.f32 1.6, %v2219_v25  ;;  %v1353_v40 = vsub.f32 1.6, %v2238_v45  ;;  %v1105_v54 = vmul.f32 2.5, %v1065_v2 }
 0x14e   :  { %3161 = vst [vmem:[#allocation25_spill] sm:$0xff] %v2501_v63  ;;  %v2507_v9 = vmul.f32 2.5, %v1068_v59  ;;  %v2509_v30 = vmul.f32 2.5, %v1069_v44  ;;  %v1140_v26 = vmul.f32 %v2219_v25, %v2501_v63  ;;  %v1141_v37 = vmul.f32 %v2238_v45, %v2503_v34 }
 0x14f   :  { %3162 = vst [vmem:[#allocation26_spill] sm:$0xff] %v2503_v34  ;;  %v1144_v46 = vmul.f32 %v2192_v14, %v1104_v48  ;;  %v1212_v23 = vmul.f32 %v1176_v43, %v1104_v48  ;;  %v2517_v10 = vadd.f32 -0.6, %v2185_v6  ;;  %v1145_v38 = vmul.f32 %v2201_v62, %v1105_v54 }
 0x150   :  { %3163 = vst [vmem:[#allocation27_spill] sm:$0xff] %v2507_v9  ;;  %v1213_v55 = vmul.f32 %v1177_v57, %v1105_v54  ;;  %v1216_v56 = vmul.f32 %v1180_v27, %v2507_v9  ;;  %v1217_v47 = vmul.f32 %v1181_v19, %v2509_v30  ;;  %v2523_v21 = vadd.f32 -0.6, %v2187_v8 }
 0x151   :  { %3164 = vst [vmem:[#allocation28_spill] sm:$0xff] %v2509_v30  ;;  %v1248_v52 = vadd.f32 %v1212_v23, %v1140_v26  ;;  %v2526_v16 = vadd.f32 -1.0, %v2185_v6  ;;  %v2529_v12 = vadd.f32 -1.0, %v2187_v8  ;;  %v2532_v2 = vadd.f32 -1.4, %v2185_v6 }
 0x152   :  { %v1249_v43 = vadd.f32 %v1213_v55, %v1141_v37  ;;  %v1252_v53 = vadd.f32 %v1216_v56, %v1144_v46  ;;  %v1253_v28 = vadd.f32 %v1217_v47, %v1145_v38  ;;  %v2537_v19 = vadd.f32 -1.4, %v2187_v8 }
 0x153   :  { %v2534_v57 = vmul.f32 1.25, %v1248_v52  ;;  %v1661_v27 = vadd.f32 -1.8, %v2185_v6  ;;  %vm736_vm2 = vcmp.ge.f32.partialorder %v2517_v10, 0.0  ;;  %v1662_v54 = vadd.f32 -1.8, %v2187_v8 }
 0x154   :  { %v2541_v59 = vmul.f32 1.25, %v1249_v43  ;;  %v2543_v44 = vmul.f32 1.25, %v1252_v53  ;;  %v2545_v48 = vmul.f32 1.25, %v1253_v28  ;;  %vm737_vm11 = vcmp.ge.f32.partialorder %v2523_v21, 0.0 }
 0x155   :  { %3165 = vst [vmem:[#allocation29_spill] sm:$0xff] %v2534_v57  ;;  %v1320_v26 = vmul.f32 %v2219_v25, %v2534_v57  ;;  %vm740_vm6 = vcmp.ge.f32.partialorder %v2526_v16, 0.0  ;;  %vm741_vm5 = vcmp.ge.f32.partialorder %v2529_v12, 0.0  ;;  %vm780_vm7 = vcmp.lt.f32.partialorder %v2517_v10, 0.4 }
 0x156   :  { %3166 = vst [vmem:[#allocation30_spill] sm:$0xff] %v2541_v59  ;;  %v1321_v37 = vmul.f32 %v2238_v45, %v2541_v59  ;;  %v1384_v46 = vmul.f32 %v1352_v0, %v2543_v44  ;;  %v1385_v23 = vmul.f32 %v1353_v40, %v2545_v48  ;;  %vm781_vm3 = vcmp.lt.f32.partialorder %v2523_v21, 0.4  ;;  %vm824_vm13 = vmand %vm736_vm2, %vm780_vm7 }
 0x157   :  { %3167 = vst [vmem:[#allocation31_spill] sm:$0xff] %v2543_v44  ;;  %vm784_vm10 = vcmp.lt.f32.partialorder %v2526_v16, 0.4  ;;  %vm785_vm14 = vcmp.lt.f32.partialorder %v2529_v12, 0.4  ;;  %vm825_vm8 = vmand %vm737_vm11, %vm781_vm3  ;;  %v2574_v40 = vsel %vm824_vm13, 1.0, %v3157_v22 }
 0x158   :  { %3168 = vst [vmem:[#allocation32_spill] sm:$0xff] %v2545_v48  ;;  %v1416_v25 = vadd.f32 %v1384_v46, %v1320_v26  ;;  %v1417_v38 = vadd.f32 %v1385_v23, %v1321_v37  ;;  %vm788_vm15 = vcmp.lt.f32.partialorder %v2532_v2, 0.4  ;;  %vm789_vm0 = vcmp.lt.f32.partialorder %v2537_v19, 0.4  ;;  %vm828_vm1 = vmand %vm740_vm6, %vm784_vm10 }
 0x159   :  { %vm792_vm12 = vcmp.lt.f32.partialorder %v1661_v27, 0.4  ;;  %vm793_vm4 = vcmp.lt.f32.partialorder %v1662_v54, 0.4  ;;  %vm829_vm9 = vmand %vm741_vm5, %vm785_vm14  ;;  %3169 = vst [vmem:[#allocation33_spill] sm:$0xff] %v2574_v40  ;;  %v2577_v55 = vsel %vm825_vm8, 1.0, %v3157_v22  ;;  %v956_v43 = vmul.f32 %v2574_v40, %v2517_v10 }
 0x15a   :  { %v1448_v45 = vmul.f32 0.8333333, %v1416_v25  ;;  %v1449_v0 = vmul.f32 0.8333333, %v1417_v38  ;;  %3170 = vst [vmem:[#allocation34_spill] sm:$0xff] %v2577_v55  ;;  %v1697_v56 = vsel %vm828_vm1, 1.0, %v3157_v22  ;;  %v957_v53 = vmul.f32 %v2577_v55, %v2523_v21 }
 0x15b   :  { %vm3171_vm2 = vcmp.ge.f32.partialorder %v2532_v2, 0.0  ;;  %v1698_v52 = vsel %vm829_vm9, 1.0, %v3157_v22  ;;  %vm3172_vm6 = vcmp.ge.f32.partialorder %v2537_v19, 0.0  ;;  %v960_v26 = vmul.f32 %v1697_v56, %v2526_v16 }
 0x15c   :  { %v1474_v47 = vpack.c.bf16 %v1449_v0, %v1448_v45  ;;  %vm832_vm11 = vmand %vm3171_vm2, %vm788_vm15  ;;  %v961_v37 = vmul.f32 %v1698_v52, %v2529_v12  ;;  %v996_v46 = vsub.f32 0.8, %v2517_v10  ;;  %vm3173_vm9 = vcmp.ge.f32.partialorder %v1661_v27, 0.0 }
 0x15d   :  { %vm833_vm5 = vmand %vm3172_vm6, %vm789_vm0  ;;  %v1701_v28 = vsel %vm832_vm11, 1.0, %v3157_v22  ;;  %v997_v38 = vsub.f32 0.8, %v2523_v21  ;;  %v1000_v45 = vsub.f32 0.8, %v2526_v16  ;;  %vm3174_vm7 = vcmp.ge.f32.partialorder %v1662_v54, 0.0 }
 0x15e   :  { %1492 = vmatpush.bf16.msra.mxu2 %v1474_v47  ;;  %vm836_vm1 = vmand %vm3173_vm9, %vm792_vm12  ;;  %v1702_v23 = vsel %vm833_vm5, 1.0, %v3157_v22  ;;  %v964_v25 = vmul.f32 %v1701_v28, %v2532_v2  ;;  %v1001_v47 = vsub.f32 0.8, %v2529_v12  ;;  %v1004_v27 = vsub.f32 0.8, %v2532_v2 }
 0x15f   :  { %vm837_vm3 = vmand %vm3174_vm7, %vm793_vm4  ;;  %v1705_v0 = vsel %vm836_vm1, 1.0, %v3157_v22  ;;  %v965_v62 = vmul.f32 %v1702_v23, %v2537_v19  ;;  %v1005_v14 = vsub.f32 0.8, %v2537_v19  ;;  %v1036_v44 = vmul.f32 %v1697_v56, %v996_v46 }
 0x160   :  { %v1706_v48 = vsel %vm837_vm3, 1.0, %v3157_v22  ;;  %v1037_v30 = vmul.f32 %v1698_v52, %v997_v38  ;;  %v1040_v15 = vmul.f32 %v1701_v28, %v1000_v45  ;;  %v1041_v9 = vmul.f32 %v1702_v23, %v1001_v47 }
 0x161   :  { %v1044_v24 = vmul.f32 %v1705_v0, %v1004_v27  ;;  %v1045_v60 = vmul.f32 %v1706_v48, %v1005_v14  ;;  %v1076_v54 = vadd.f32 %v1036_v44, %v956_v43  ;;  %v1192_v40 = vsub.f32 1.2, %v2517_v10 }
 0x162   :  { %v1077_v55 = vadd.f32 %v1037_v30, %v957_v53  ;;  %v1080_v59 = vadd.f32 %v1040_v15, %v960_v26  ;;  %v1081_v57 = vadd.f32 %v1041_v9, %v961_v37  ;;  %v1193_v63 = vsub.f32 1.2, %v2523_v21 }
 0x163   :  { %v1084_v34 = vadd.f32 %v1044_v24, %v964_v25  ;;  %v1085_v2 = vadd.f32 %v1045_v60, %v965_v62  ;;  %v2611_v11 = vmul.f32 2.5, %v1076_v54  ;;  %v1196_v19 = vsub.f32 1.2, %v2526_v16 }
 0x164   :  { %v2613_v4 = vmul.f32 2.5, %v1077_v55  ;;  %v1120_v56 = vmul.f32 2.5, %v1080_v59  ;;  %v1121_v52 = vmul.f32 2.5, %v1081_v57  ;;  %v1197_v14 = vsub.f32 1.2, %v2529_v12 }
 0x165   :  { %v1124_v28 = vmul.f32 2.5, %v1084_v34  ;;  %v1125_v30 = vmul.f32 2.5, %v1085_v2  ;;  %v1156_v15 = vmul.f32 %v2517_v10, %v2611_v11  ;;  %v1368_v62 = vsub.f32 1.6, %v2517_v10 }
 0x166   :  { %v1157_v24 = vmul.f32 %v2523_v21, %v2613_v4  ;;  %v1160_v60 = vmul.f32 %v2526_v16, %v1120_v56  ;;  %v1161_v9 = vmul.f32 %v2529_v12, %v1121_v52  ;;  %v1228_v44 = vmul.f32 %v1192_v40, %v1120_v56 }
 0x167   :  { %v1229_v48 = vmul.f32 %v1193_v63, %v1121_v52  ;;  %v1232_v59 = vmul.f32 %v1196_v19, %v1124_v28  ;;  %v1233_v57 = vmul.f32 %v1197_v14, %v1125_v30  ;;  %v1619_v34 = vmul.f32 -1.442695, %v2189_v13 }
 0x168   :  { %v1620_v55 = vmul.f32 -1.442695, %v2253_v33  ;;  %v1264_v43 = vadd.f32 %v1228_v44, %v1156_v15  ;;  %v2627_v26 = vadd.f32 1.4, %v2189_v13  ;;  %v2630_v37 = vadd.f32 1.4, %v2253_v33 }
 0x169   :  { %v1265_v53 = vadd.f32 %v1229_v48, %v1157_v24  ;;  %v1268_v46 = vadd.f32 %v1232_v59, %v1160_v60  ;;  %v1269_v16 = vadd.f32 %v1233_v57, %v1161_v9  ;;  %v1369_v12 = vsub.f32 1.6, %v2523_v21 }
 0x16a   :  { %1728 = vpow2.f32 %v1619_v34  ;;  %v2633_v63 = vmul.f32 1.25, %v1264_v43  ;;  %vm718_vm4 = vcmp.ge.f32.partialorder %v2627_v26, 0.0  ;;  %vm719_vm12 = vcmp.ge.f32.partialorder %v2630_v37, 0.0 }
 0x16b   :  { %v2635_v40 = vmul.f32 1.25, %v1265_v53  ;;  %1730 = vpow2.f32 %v1620_v55  ;;  %v1304_v23 = vmul.f32 1.25, %v1268_v46  ;;  %v1305_v25 = vmul.f32 1.25, %v1269_v16 }
 0x16c   :  { %vm762_vm10 = vcmp.lt.f32.partialorder %v2627_v26, 0.4  ;;  %v1336_v38 = vmul.f32 %v2517_v10, %v2633_v63  ;;  %vm763_vm13 = vcmp.lt.f32.partialorder %v2630_v37, 0.4  ;;  %v978_v0 = vsub.f32 0.8, %v2627_v26 }
 0x16d   :  { %v1337_v45 = vmul.f32 %v2523_v21, %v2635_v40  ;;  %vm806_vm14 = vmand %vm718_vm4, %vm762_vm10  ;;  %v1400_v47 = vmul.f32 %v1368_v62, %v1304_v23  ;;  %v1401_v27 = vmul.f32 %v1369_v12, %v1305_v25  ;;  %v979_v2 = vsub.f32 0.8, %v2630_v37 }
 0x16e   :  { %vm807_vm15 = vmand %vm719_vm12, %vm763_vm13  ;;  %v2647_v54 = vsel %vm806_vm14, 1.0, %v3157_v22  ;;  %v1018_v21 = vmul.f32 %v2242_v41, %v978_v0  ;;  %v1174_v60 = vsub.f32 1.2, %v2627_v26  ;;  %v954_v57 = vmul.f32 %v2260_v36, %v2222_v29 }
 0x16f   :  { %v2651_v19 = vsel %vm807_vm15, 1.0, %v3157_v22  ;;  %v938_v10 = vmul.f32 %v2647_v54, %v2627_v26  ;;  %v1432_v52 = vadd.f32 %v1400_v47, %v1336_v38  ;;  %v1433_v28 = vadd.f32 %v1401_v27, %v1337_v45 }
 0x170   :  { %v1729_v56 = vpop.eup %1728  ;;  %v939_v14 = vmul.f32 %v2651_v19, %v2630_v37  ;;  %v1019_v30 = vmul.f32 %v2287_v50, %v979_v2  ;;  %v955_v50 = vmul.f32 %v2302_v7, %v2275_v1  ;;  %v1175_v55 = vsub.f32 1.2, %v2630_v37 }
 0x171   :  { %v1731_v15 = vpop.eup %1730  ;;  %v2659_v24 = vadd.f32 1.0, %v1729_v56  ;;  %v1058_v62 = vadd.f32 %v1018_v21, %v938_v10  ;;  %v1464_v9 = vmul.f32 0.8333333, %v1432_v52  ;;  %v1465_v44 = vmul.f32 0.8333333, %v1433_v28 }
 0x172   :  { %v2662_v48 = vadd.f32 1.0, %v1731_v15  ;;  %v1059_v59 = vadd.f32 %v1019_v30, %v939_v14  ;;  %v1210_v43 = vmul.f32 %v1174_v60, %v2290_v51  ;;  %v1211_v7 = vmul.f32 %v1175_v55, %v2315_v32 }
 0x173   :  { %1732 = vrcp.f32 %v2659_v24  ;;  %v639_v41 = vand.u32 2147483648, %v2659_v24  ;;  %v1482_v34 = vpack.c.bf16 %v1465_v44, %v1464_v9  ;;  %v637_v53 = vand.u32 2147483647, %v2659_v24 }
 0x174   :  { %1734 = vrcp.f32 %v2662_v48  ;;  %v652_v46 = vand.u32 2147483647, %v2662_v48  ;;  %v654_v16 = vand.u32 2147483648, %v2662_v48  ;;  %v2676_v12 = vmul.f32 2.5, %v1058_v62 }
 0x175   :  { %1505 = vmatpush.bf16.msra.mxu3 %v1482_v34  ;;  %v640_v36 = vor.u32 1.1754944e-38, %v639_v41  ;;  %v2678_v23 = vmul.f32 2.5, %v1059_v59  ;;  %v1350_v25 = vsub.f32 1.6, %v2627_v26  ;;  %v1351_v45 = vsub.f32 1.6, %v2630_v37 }
 0x176   :  { %v655_v38 = vor.u32 1.1754944e-38, %v654_v16  ;;  %v1138_v51 = vmul.f32 %v2627_v26, %v2676_v12  ;;  %v994_v0 = vsub.f32 0.8, %v2222_v29  ;;  %vm633_vm0 = vweird.f32 %v2659_v24 }
 0x177   :  { %v1139_v47 = vmul.f32 %v2630_v37, %v2678_v23  ;;  %v1382_v27 = vmul.f32 %v1350_v25, %v2331_v49  ;;  %v995_v2 = vsub.f32 0.8, %v2275_v1  ;;  %v1190_v32 = vsub.f32 1.2, %v2222_v29 }
 0x178   :  { %vm648_vm8 = vweird.f32 %v2662_v48  ;;  %v1246_v21 = vadd.f32 %v1210_v43, %v1138_v51  ;;  %v1383_v56 = vmul.f32 %v1351_v45, %v2348_v58  ;;  %v1034_v52 = vmul.f32 %v2370_v42, %v994_v0 }
 0x179   :  { %v1733_v10 = vpop.eup %1732  ;;  %v1191_v28 = vsub.f32 1.2, %v2275_v1  ;;  %vm2697_vm11 = vcmp.eq.f32.partialorder %v637_v53, 8.507059e+37  ;;  %v1247_v15 = vadd.f32 %v1211_v7, %v1139_v47  ;;  %v1035_v62 = vmul.f32 %v2373_v5, %v995_v2 }
 0x17a   :  { %v1735_v14 = vpop.eup %1734  ;;  %v629_v30 = vmul.f32 %v1733_v10, %v2659_v24  ;;  %vm634_vm2 = vweird.f32 %v1733_v10  ;;  %vm2703_vm5 = vcmp.eq.f32.partialorder %v652_v46, 8.507059e+37  ;;  %v2707_v42 = vmul.f32 1.25, %v1246_v21 }
 0x17b   :  { %v644_v60 = vmul.f32 %v1735_v14, %v2662_v48  ;;  %vm649_vm6 = vweird.f32 %v1735_v14  ;;  %v1074_v9 = vadd.f32 %v1034_v52, %v954_v57  ;;  %v2709_v59 = vmul.f32 1.25, %v1247_v15  ;;  %vm635_vm9 = vmor %vm633_vm0, %vm634_vm2 }
 0x17c   :  { %v630_v44 = vsub.f32 1.0, %v629_v30  ;;  %v1075_v41 = vadd.f32 %v1035_v62, %v955_v50  ;;  %v1226_v34 = vmul.f32 %v1190_v32, %v2408_v39  ;;  %v1318_v5 = vmul.f32 %v2627_v26, %v2707_v42  ;;  %vm650_vm1 = vmor %vm648_vm8, %vm649_vm6 }
 0x17d   :  { %v645_v55 = vsub.f32 1.0, %v644_v60  ;;  %v2714_v43 = vmul.f32 2.5, %v1074_v9  ;;  %v1227_v53 = vmul.f32 %v1191_v28, %v2412_v20  ;;  %v1319_v16 = vmul.f32 %v2630_v37, %v2709_v59 }
 0x17e   :  { %v631_v46 = vmul.f32 %v1733_v10, %v630_v44  ;;  %v2719_v7 = vmul.f32 2.5, %v1075_v41  ;;  %v1366_v57 = vsub.f32 1.6, %v2222_v29  ;;  %v1414_v50 = vadd.f32 %v1382_v27, %v1318_v5 }
 0x17f   :  { %v646_v25 = vmul.f32 %v1735_v14, %v645_v55  ;;  %v1154_v39 = vmul.f32 %v2222_v29, %v2714_v43  ;;  %v1367_v51 = vsub.f32 1.6, %v2275_v1  ;;  %v1415_v45 = vadd.f32 %v1383_v56, %v1319_v16 }
 0x180   :  { %v632_v26 = vadd.f32 %v1733_v10, %v631_v46  ;;  %v1155_v20 = vmul.f32 %v2275_v1, %v2719_v7  ;;  %v1398_v0 = vmul.f32 %v1366_v57, %v2427_v3  ;;  %v1446_v47 = vmul.f32 0.8333333, %v1414_v50 }
 0x181   :  { %v647_v37 = vadd.f32 %v1735_v14, %v646_v25  ;;  %v1262_v2 = vadd.f32 %v1226_v34, %v1154_v39  ;;  %v1399_v27 = vmul.f32 %v1367_v51, %v2432_v35  ;;  %v1447_v21 = vmul.f32 0.8333333, %v1415_v45 }
 0x182   :  { %v636_v32 = vsel %vm635_vm9, %v1733_v10, %v632_v26  ;;  %v1263_v56 = vadd.f32 %v1227_v53, %v1155_v20  ;;  %v1617_v52 = vmul.f32 -1.442695, %v2185_v6  ;;  %v1618_v30 = vmul.f32 -1.442695, %v2187_v8 }
 0x183   :  { %v641_v3 = vsel %vm2697_vm11, %v640_v36, %v636_v32  ;;  %v651_v28 = vsel %vm650_vm1, %v1735_v14, %v647_v37  ;;  %v2738_v24 = vmul.f32 1.25, %v1262_v2  ;;  %v1473_v15 = vpack.c.bf16 %v1447_v21, %v1446_v47  ;;  %v3179_v47 = vld [vmem:[#allocation15_spill] sm:$0xff]  ;;  %v3180_v2 = vld [vmem:[#allocation24_spill] sm:$0xff]  ;;  %v3181_v32 = vld [vmem:[#allocation25_spill] sm:$0xff] }
 0x184   :  { %v656_v35 = vsel %vm2703_vm5, %v655_v38, %v651_v28  ;;  %v660_v10 = vmul.f32 %v641_v3, %v2189_v13  ;;  %v2744_v48 = vmul.f32 1.25, %v1263_v56  ;;  %1736 = vpow2.f32 %v1617_v52  ;;  %v3182_v56 = vld [vmem:[#allocation26_spill] sm:$0xff] }
 0x185   :  { %v661_v62 = vmul.f32 %v656_v35, %v2253_v33  ;;  %v1334_v60 = vmul.f32 %v2222_v29, %v2738_v24  ;;  %v2750_v36 = vadd.f32 1.4, %v2185_v6  ;;  %1493 = vmatpush.bf16.msra.mxu2 %v1473_v15  ;;  %1738 = vpow2.f32 %v1618_v30 }
 0x186   :  { %v1335_v14 = vmul.f32 %v2275_v1, %v2744_v48  ;;  %v2755_v38 = vadd.f32 1.4, %v2187_v8  ;;  %v952_v26 = vmul.f32 %v2482_v61, %v2198_v18 }
 0x187   :  { %v663_v49 = vpack.c.bf16 %v661_v62, %v660_v10  ;;  %v1430_v58 = vadd.f32 %v1398_v0, %v1334_v60  ;;  %vm716_vm7 = vcmp.ge.f32.partialorder %v2750_v36, 0.0  ;;  %vm760_vm3 = vcmp.lt.f32.partialorder %v2750_v36, 0.4  ;;  %v3183_v60 = vld [vmem:[#allocation29_spill] sm:$0xff] }
 0x188   :  { %v1431_v9 = vadd.f32 %v1399_v27, %v1335_v14  ;;  %vm717_vm4 = vcmp.ge.f32.partialorder %v2755_v38, 0.0  ;;  %vm761_vm12 = vcmp.lt.f32.partialorder %v2755_v38, 0.4  ;;  %vm804_vm10 = vmand %vm716_vm7, %vm760_vm3  ;;  %v976_v29 = vsub.f32 0.8, %v2750_v36 }
 0x189   :  { %1527 = vmatpush.bf16.msrb.mxu1 %v663_v49  ;;  %v1462_v1 = vmul.f32 0.8333333, %v1430_v58  ;;  %vm805_vm13 = vmand %vm717_vm4, %vm761_vm12  ;;  %v2763_v44 = vsel %vm804_vm10, 1.0, %v3157_v22  ;;  %v977_v41 = vsub.f32 0.8, %v2755_v38  ;;  %v953_v27 = vmul.f32 %v3180_v2, %v3179_v47 }
 0x18a   :  { %v1463_v34 = vmul.f32 0.8333333, %v1431_v9  ;;  %v2767_v55 = vsel %vm805_vm13, 1.0, %v3157_v22  ;;  %v936_v5 = vmul.f32 %v2763_v44, %v2750_v36  ;;  %v1016_v53 = vmul.f32 %v2454_v17, %v976_v29  ;;  %v1737_v46 = vpop.eup %1736 }
 0x18b   :  { %v937_v16 = vmul.f32 %v2767_v55, %v2755_v38  ;;  %v1017_v57 = vmul.f32 %v2457_v31, %v977_v41  ;;  %v1739_v25 = vpop.eup %1738  ;;  %v2775_v39 = vadd.f32 1.0, %v1737_v46  ;;  %v1172_v0 = vsub.f32 1.2, %v2750_v36 }
 0x18c   :  { %v1481_v50 = vpack.c.bf16 %v1463_v34, %v1462_v1  ;;  %v1056_v51 = vadd.f32 %v1016_v53, %v936_v5  ;;  %v2779_v45 = vadd.f32 1.0, %v1739_v25  ;;  %v1173_v17 = vsub.f32 1.2, %v2755_v38  ;;  %v3184_v1 = vld [vmem:[#allocation30_spill] sm:$0xff]  ;;  %v3185_v25 = vld [vmem:[#allocation33_spill] sm:$0xff] }
 0x18d   :  { %v1057_v20 = vadd.f32 %v1017_v57, %v937_v16  ;;  %1740 = vrcp.f32 %v2775_v39  ;;  %v609_v31 = vand.u32 2147483648, %v2775_v39  ;;  %v1348_v37 = vsub.f32 1.6, %v2750_v36 }
 0x18e   :  { %1506 = vmatpush.bf16.msra.mxu3 %v1481_v50  ;;  %1742 = vrcp.f32 %v2779_v45  ;;  %v624_v61 = vand.u32 2147483648, %v2779_v45  ;;  %v1208_v21 = vmul.f32 %v1172_v0, %v3181_v32  ;;  %v1209_v52 = vmul.f32 %v1173_v17, %v3182_v56 }
 0x18f   :  { %v607_v3 = vand.u32 2147483647, %v2775_v39  ;;  %v622_v28 = vand.u32 2147483647, %v2779_v45  ;;  %v2794_v30 = vmul.f32 2.5, %v1056_v51  ;;  %v2796_v35 = vmul.f32 2.5, %v1057_v20 }
 0x190   :  { %v610_v10 = vor.u32 1.1754944e-38, %v609_v31  ;;  %v2798_v15 = vor.u32 1.1754944e-38, %v624_v61  ;;  %v1349_v62 = vsub.f32 1.6, %v2755_v38  ;;  %v1380_v14 = vmul.f32 %v1348_v37, %v3183_v60  ;;  %v3186_v51 = vld [vmem:[#allocation34_spill] sm:$0xff] }
 0x191   :  { %v1136_v49 = vmul.f32 %v2750_v36, %v2794_v30  ;;  %v1137_v58 = vmul.f32 %v2755_v38, %v2796_v35  ;;  %v992_v9 = vsub.f32 0.8, %v2198_v18  ;;  %v993_v29 = vsub.f32 0.8, %v3179_v47 }
 0x192   :  { %vm603_vm14 = vweird.f32 %v2775_v39  ;;  %v1381_v41 = vmul.f32 %v1349_v62, %v3184_v1  ;;  %v1188_v34 = vsub.f32 1.2, %v2198_v18  ;;  %v1189_v5 = vsub.f32 1.2, %v3179_v47 }
 0x193   :  { %v1364_v53 = vsub.f32 1.6, %v2198_v18  ;;  %v1741_v46 = vpop.eup %1740  ;;  %vm618_vm15 = vweird.f32 %v2779_v45  ;;  %v1244_v16 = vadd.f32 %v1208_v21, %v1136_v49  ;;  %v1245_v57 = vadd.f32 %v1209_v52, %v1137_v58 }
 0x194   :  { %v1032_v50 = vmul.f32 %v3185_v25, %v992_v9  ;;  %v1033_v20 = vmul.f32 %v3186_v51, %v993_v29  ;;  %v1743_v0 = vpop.eup %1742  ;;  %v599_v17 = vmul.f32 %v1741_v46, %v2775_v39  ;;  %vm604_vm0 = vweird.f32 %v1741_v46 }
 0x195   :  { %vm2817_vm8 = vcmp.eq.f32.partialorder %v607_v3, 8.507059e+37  ;;  %v1224_v37 = vmul.f32 %v1188_v34, %v2611_v11  ;;  %v1225_v2 = vmul.f32 %v1189_v5, %v2613_v4  ;;  %v614_v61 = vmul.f32 %v1743_v0, %v2779_v45  ;;  %vm605_vm6 = vmor %vm603_vm14, %vm604_vm0 }
 0x196   :  { %vm619_vm2 = vweird.f32 %v1743_v0  ;;  %vm2824_vm11 = vcmp.eq.f32.partialorder %v622_v28, 8.507059e+37  ;;  %v2828_v21 = vmul.f32 1.25, %v1244_v16  ;;  %v2830_v56 = vmul.f32 1.25, %v1245_v57 }
 0x197   :  { %v600_v52 = vsub.f32 1.0, %v599_v17  ;;  %v1072_v3 = vadd.f32 %v1032_v50, %v952_v26  ;;  %v1073_v62 = vadd.f32 %v1033_v20, %v953_v27  ;;  %v1365_v60 = vsub.f32 1.6, %v3179_v47  ;;  %vm620_vm9 = vmor %vm618_vm15, %vm619_vm2 }
 0x198   :  { %v615_v49 = vsub.f32 1.0, %v614_v61  ;;  %v1316_v4 = vmul.f32 %v2750_v36, %v2828_v21  ;;  %v1317_v11 = vmul.f32 %v2755_v38, %v2830_v56  ;;  %v1396_v28 = vmul.f32 %v1364_v53, %v2633_v63 }
 0x199   :  { %v601_v58 = vmul.f32 %v1741_v46, %v600_v52  ;;  %v2838_v9 = vmul.f32 2.5, %v1072_v3  ;;  %v2840_v29 = vmul.f32 2.5, %v1073_v62  ;;  %v1397_v1 = vmul.f32 %v1365_v60, %v2635_v40 }
 0x19a   :  { %v616_v26 = vmul.f32 %v1743_v0, %v615_v49  ;;  %v1412_v27 = vadd.f32 %v1380_v14, %v1316_v4  ;;  %v1413_v34 = vadd.f32 %v1381_v41, %v1317_v11  ;;  %v2844_v5 = vadd.f32 1.8, %v2189_v13 }
 0x19b   :  { %v602_v16 = vadd.f32 %v1741_v46, %v601_v58  ;;  %v1152_v36 = vmul.f32 %v2198_v18, %v2838_v9  ;;  %v1153_v63 = vmul.f32 %v3179_v47, %v2840_v29  ;;  %v2851_v38 = vadd.f32 1.8, %v2253_v33 }
 0x19c   :  { %v617_v40 = vadd.f32 %v1743_v0, %v616_v26  ;;  %v1444_v14 = vmul.f32 0.8333333, %v1412_v27  ;;  %v1445_v41 = vmul.f32 0.8333333, %v1413_v34  ;;  %vm714_vm5 = vcmp.ge.f32.partialorder %v2844_v5, 0.0 }
 0x19d   :  { %v606_v53 = vsel %vm605_vm6, %v1741_v46, %v602_v16  ;;  %v1260_v57 = vadd.f32 %v1224_v37, %v1152_v36  ;;  %v1261_v25 = vadd.f32 %v1225_v2, %v1153_v63  ;;  %vm715_vm1 = vcmp.ge.f32.partialorder %v2851_v38, 0.0 }
 0x19e   :  { %v611_v50 = vsel %vm2817_vm8, %v610_v10, %v606_v53  ;;  %v621_v51 = vsel %vm620_vm9, %v1743_v0, %v617_v40  ;;  %v1472_v39 = vpack.c.bf16 %v1445_v41, %v1444_v14  ;;  %vm758_vm7 = vcmp.lt.f32.partialorder %v2844_v5, 0.4  ;;  %v3191_v14 = vld [vmem:[#allocation20_spill] sm:$0xff]  ;;  %v3192_v41 = vld [vmem:[#allocation17_spill] sm:$0xff] }
 0x19f   :  { %v626_v20 = vsel %vm2824_vm11, %v2798_v15, %v621_v51  ;;  %v658_v46 = vmul.f32 %v611_v50, %v2185_v6  ;;  %v2868_v17 = vmul.f32 1.25, %v1260_v57  ;;  %v2870_v45 = vmul.f32 1.25, %v1261_v25  ;;  %vm802_vm3 = vmand %vm714_vm5, %vm758_vm7  ;;  %v3193_v25 = vld [vmem:[#allocation21_spill] sm:$0xff]  ;;  %v3194_v50 = vld [vmem:[#allocation19_spill] sm:$0xff] }
 0x1a0   :  { %v659_v37 = vmul.f32 %v626_v20, %v2187_v8  ;;  %1494 = vmatpush.bf16.msra.mxu2 %v1472_v39  ;;  %vm759_vm4 = vcmp.lt.f32.partialorder %v2851_v38, 0.4  ;;  %v2875_v10 = vsel %vm802_vm3, 1.0, %v3157_v22  ;;  %v974_v0 = vsub.f32 0.8, %v2844_v5 }
 0x1a1   :  { %v1332_v15 = vmul.f32 %v2198_v18, %v2868_v17  ;;  %v1333_v31 = vmul.f32 %v3179_v47, %v2870_v45  ;;  %vm803_vm12 = vmand %vm715_vm1, %vm759_vm4  ;;  %v934_v2 = vmul.f32 %v2875_v10, %v2844_v5  ;;  %v975_v61 = vsub.f32 0.8, %v2851_v38 }
 0x1a2   :  { %v662_v32 = vpack.c.bf16 %v659_v37, %v658_v46  ;;  %v2888_v52 = vsel %vm803_vm12, 1.0, %v3157_v22  ;;  %v1014_v3 = vmul.f32 %v2647_v54, %v974_v0  ;;  %v1170_v4 = vsub.f32 1.2, %v2844_v5 }
 0x1a3   :  { %v1428_v62 = vadd.f32 %v1396_v28, %v1332_v15  ;;  %v1429_v60 = vadd.f32 %v1397_v1, %v1333_v31  ;;  %v935_v18 = vmul.f32 %v2888_v52, %v2851_v38  ;;  %v1015_v47 = vmul.f32 %v2651_v19, %v975_v61 }
 0x1a4   :  { %1528 = vmatpush.bf16.msrb.mxu1 %v662_v32  ;;  %v1054_v49 = vadd.f32 %v1014_v3, %v934_v2  ;;  %v1171_v11 = vsub.f32 1.2, %v2851_v38  ;;  %v1346_v58 = vsub.f32 1.6, %v2844_v5  ;;  %v1347_v54 = vsub.f32 1.6, %v2851_v38 }
 0x1a5   :  { %v1460_v26 = vmul.f32 0.8333333, %v1428_v62  ;;  %v1461_v27 = vmul.f32 0.8333333, %v1429_v60  ;;  %v1055_v34 = vadd.f32 %v1015_v47, %v935_v18  ;;  %v1206_v1 = vmul.f32 %v1170_v4, %v2676_v12 }
 0x1a6   :  { %v2898_v28 = vmul.f32 2.5, %v1054_v49  ;;  %v1207_v16 = vmul.f32 %v1171_v11, %v2678_v23  ;;  %v1378_v19 = vmul.f32 %v1346_v58, %v2707_v42  ;;  %v1379_v40 = vmul.f32 %v1347_v54, %v2709_v59 }
 0x1a7   :  { %v1480_v36 = vpack.c.bf16 %v1461_v27, %v1460_v26  ;;  %v2903_v63 = vmul.f32 2.5, %v1055_v34  ;;  %v1150_v53 = vmul.f32 %v3192_v41, %v3191_v14  ;;  %v1151_v51 = vmul.f32 %v3194_v50, %v3193_v25 }
 0x1a8   :  { %v1134_v57 = vmul.f32 %v2844_v5, %v2898_v28  ;;  %v1186_v12 = vsub.f32 1.2, %v3192_v41  ;;  %v1187_v23 = vsub.f32 1.2, %v3194_v50  ;;  %v1362_v39 = vsub.f32 1.6, %v3192_v41 }
 0x1a9   :  { %1507 = vmatpush.bf16.msra.mxu3 %v1480_v36  ;;  %v1135_v42 = vmul.f32 %v2851_v38, %v2903_v63  ;;  %v2918_v59 = vadd.f32 1.8, %v2185_v6  ;;  %v2921_v20 = vadd.f32 1.8, %v2187_v8  ;;  %v1363_v15 = vsub.f32 1.6, %v3194_v50 }
 0x1aa   :  { %v1242_v46 = vadd.f32 %v1206_v1, %v1134_v57  ;;  %v1222_v37 = vmul.f32 %v1186_v12, %v2714_v43  ;;  %v1223_v0 = vmul.f32 %v1187_v23, %v2719_v7  ;;  %v1394_v2 = vmul.f32 %v1362_v39, %v2738_v24  ;;  %v3195_v1 = vld [vmem:[#allocation27_spill] sm:$0xff] }
 0x1ab   :  { %v1243_v31 = vadd.f32 %v1207_v16, %v1135_v42  ;;  %vm712_vm10 = vcmp.ge.f32.partialorder %v2918_v59, 0.0  ;;  %vm713_vm13 = vcmp.ge.f32.partialorder %v2921_v20, 0.0  ;;  %vm756_vm14 = vcmp.lt.f32.partialorder %v2918_v59, 0.4  ;;  %v3196_v16 = vld [vmem:[#allocation12_spill] sm:$0xff] }
 0x1ac   :  { %v2929_v61 = vmul.f32 1.25, %v1242_v46  ;;  %v1258_v32 = vadd.f32 %v1222_v37, %v1150_v53  ;;  %v1259_v3 = vadd.f32 %v1223_v0, %v1151_v51  ;;  %v1395_v43 = vmul.f32 %v1363_v15, %v2744_v48  ;;  %vm800_vm0 = vmand %vm712_vm10, %vm756_vm14 }
 0x1ad   :  { %v2932_v62 = vmul.f32 1.25, %v1243_v31  ;;  %vm757_vm15 = vcmp.lt.f32.partialorder %v2921_v20, 0.4  ;;  %v972_v7 = vsub.f32 0.8, %v2918_v59  ;;  %v2944_v47 = vsel %vm800_vm0, 1.0, %v3157_v22 }
 0x1ae   :  { %v1314_v24 = vmul.f32 %v2844_v5, %v2929_v61  ;;  %v2939_v60 = vmul.f32 1.25, %v1258_v32  ;;  %v2941_v18 = vmul.f32 1.25, %v1259_v3  ;;  %vm801_vm8 = vmand %vm713_vm13, %vm757_vm15  ;;  %v932_v4 = vmul.f32 %v2944_v47, %v2918_v59  ;;  %v3197_v32 = vld [vmem:[#allocation28_spill] sm:$0xff]  ;;  %v3198_v3 = vld [vmem:[#allocation14_spill] sm:$0xff] }
 0x1af   :  { %v1315_v49 = vmul.f32 %v2851_v38, %v2932_v62  ;;  %v2949_v48 = vsel %vm801_vm8, 1.0, %v3157_v22  ;;  %v973_v11 = vsub.f32 0.8, %v2921_v20  ;;  %v1012_v38 = vmul.f32 %v2763_v44, %v972_v7 }
 0x1b0   :  { %v1410_v5 = vadd.f32 %v1378_v19, %v1314_v24  ;;  %v1330_v58 = vmul.f32 %v3192_v41, %v2939_v60  ;;  %v1331_v26 = vmul.f32 %v3194_v50, %v2941_v18  ;;  %v933_v27 = vmul.f32 %v2949_v48, %v2921_v20 }
 0x1b1   :  { %v1411_v34 = vadd.f32 %v1379_v40, %v1315_v49  ;;  %v1013_v54 = vmul.f32 %v2767_v55, %v973_v11  ;;  %v1148_v36 = vmul.f32 %v3196_v16, %v3195_v1  ;;  %v1168_v57 = vsub.f32 1.2, %v2918_v59 }
 0x1b2   :  { %v1442_v14 = vmul.f32 0.8333333, %v1410_v5  ;;  %v1426_v53 = vadd.f32 %v1394_v2, %v1330_v58  ;;  %v1427_v19 = vadd.f32 %v1395_v43, %v1331_v26  ;;  %v1052_v25 = vadd.f32 %v1012_v38, %v932_v4 }
 0x1b3   :  { %v1443_v41 = vmul.f32 0.8333333, %v1411_v34  ;;  %v1053_v51 = vadd.f32 %v1013_v54, %v933_v27  ;;  %v1169_v50 = vsub.f32 1.2, %v2921_v20  ;;  %v1204_v40 = vmul.f32 %v1168_v57, %v2794_v30 }
 0x1b4   :  { %v1458_v12 = vmul.f32 0.8333333, %v1426_v53  ;;  %v1459_v23 = vmul.f32 0.8333333, %v1427_v19  ;;  %v1344_v44 = vsub.f32 1.6, %v2918_v59  ;;  %v1149_v43 = vmul.f32 %v3198_v3, %v3197_v32 }
 0x1b5   :  { %v1471_v55 = vpack.c.bf16 %v1443_v41, %v1442_v14  ;;  %v2968_v42 = vmul.f32 2.5, %v1052_v25  ;;  %v2970_v39 = vmul.f32 2.5, %v1053_v51  ;;  %v1205_v46 = vmul.f32 %v1169_v50, %v2796_v35 }
 0x1b6   :  { %v1479_v37 = vpack.c.bf16 %v1459_v23, %v1458_v12  ;;  %v1345_v0 = vsub.f32 1.6, %v2921_v20  ;;  %v1376_v15 = vmul.f32 %v1344_v44, %v2828_v21  ;;  %v1184_v31 = vsub.f32 1.2, %v3196_v16 }
 0x1b7   :  { %1495 = vmatpush.bf16.msra.mxu2 %v1471_v55  ;;  %v1132_v30 = vmul.f32 %v2918_v59, %v2968_v42  ;;  %v1133_v2 = vmul.f32 %v2921_v20, %v2970_v39  ;;  %v1185_v7 = vsub.f32 1.2, %v3198_v3  ;;  %v1360_v21 = vsub.f32 1.6, %v3196_v16 }
 0x1b8   :  { %1508 = vmatpush.bf16.msra.mxu3 %v1479_v37  ;;  %v1377_v35 = vmul.f32 %v1345_v0, %v2830_v56  ;;  %v1220_v24 = vmul.f32 %v1184_v31, %v2838_v9  ;;  %v2987_v49 = vadd.f32 2.2, %v2189_v13  ;;  %v2991_v58 = vadd.f32 2.2, %v2253_v33  ;;  %v3199_v37 = vld [vmem:[#allocation22_spill] sm:$0xff]  ;;  %v3200_v0 = vld [vmem:[#allocation16_spill] sm:$0xff] }
 0x1b9   :  { %v1240_v4 = vadd.f32 %v1204_v40, %v1132_v30  ;;  %v1241_v11 = vadd.f32 %v1205_v46, %v1133_v2  ;;  %v1221_v5 = vmul.f32 %v1185_v7, %v2840_v29  ;;  %v1361_v27 = vsub.f32 1.6, %v3198_v3 }
 0x1ba   :  { %v1256_v26 = vadd.f32 %v1220_v24, %v1148_v36  ;;  %v1392_v34 = vmul.f32 %v1360_v21, %v2868_v17  ;;  %vm710_vm2 = vcmp.ge.f32.partialorder %v2987_v49, 0.0  ;;  %vm711_vm11 = vcmp.ge.f32.partialorder %v2991_v58, 0.0  ;;  %v3201_v24 = vld [vmem:[#allocation23_spill] sm:$0xff]  ;;  %v3202_v21 = vld [vmem:[#allocation18_spill] sm:$0xff] }
 0x1bb   :  { %v2996_v56 = vmul.f32 1.25, %v1240_v4  ;;  %v2998_v9 = vmul.f32 1.25, %v1241_v11  ;;  %v1257_v13 = vadd.f32 %v1221_v5, %v1149_v43  ;;  %v1393_v29 = vmul.f32 %v1361_v27, %v2870_v45 }
 0x1bc   :  { %v3001_v38 = vmul.f32 1.25, %v1256_v26  ;;  %vm754_vm6 = vcmp.lt.f32.partialorder %v2987_v49, 0.4  ;;  %vm755_vm5 = vcmp.lt.f32.partialorder %v2991_v58, 0.4  ;;  %v1327_v4 = vmul.f32 %v3202_v21, %v3201_v24 }
 0x1bd   :  { %v1312_v33 = vmul.f32 %v2918_v59, %v2996_v56  ;;  %v1313_v17 = vmul.f32 %v2921_v20, %v2998_v9  ;;  %v3010_v54 = vmul.f32 1.25, %v1257_v13  ;;  %vm798_vm9 = vmand %vm710_vm2, %vm754_vm6  ;;  %v970_v1 = vsub.f32 0.8, %v2987_v49 }
 0x1be   :  { %v1328_v36 = vmul.f32 %v3196_v16, %v3001_v38  ;;  %vm799_vm1 = vmand %vm711_vm11, %vm755_vm5  ;;  %v1667_v45 = vsel %vm798_vm9, 1.0, %v3157_v22  ;;  %v971_v14 = vsub.f32 0.8, %v2991_v58  ;;  %v1166_v53 = vsub.f32 1.2, %v2987_v49 }
 0x1bf   :  { %v1408_v19 = vadd.f32 %v1376_v15, %v1312_v33  ;;  %v1409_v59 = vadd.f32 %v1377_v35, %v1313_v17  ;;  %v1329_v20 = vmul.f32 %v3198_v3, %v3010_v54  ;;  %v1668_v57 = vsel %vm799_vm1, 1.0, %v3157_v22 }
 0x1c0   :  { %v1424_v41 = vadd.f32 %v1392_v34, %v1328_v36  ;;  %v930_v25 = vmul.f32 %v1667_v45, %v2987_v49  ;;  %v931_v51 = vmul.f32 %v1668_v57, %v2991_v58  ;;  %v1010_v16 = vmul.f32 %v2875_v10, %v970_v1 }
 0x1c1   :  { %v1440_v50 = vmul.f32 0.8333333, %v1408_v19  ;;  %v1441_v12 = vmul.f32 0.8333333, %v1409_v59  ;;  %v1425_v23 = vadd.f32 %v1393_v29, %v1329_v20  ;;  %v1011_v40 = vmul.f32 %v2888_v52, %v971_v14 }
 0x1c2   :  { %v1456_v44 = vmul.f32 0.8333333, %v1424_v41  ;;  %v1050_v55 = vadd.f32 %v1010_v16, %v930_v25  ;;  %v1167_v46 = vsub.f32 1.2, %v2991_v58  ;;  %v1326_v15 = vmul.f32 %v3200_v0, %v3199_v37 }
 0x1c3   :  { %v1470_v31 = vpack.c.bf16 %v1441_v12, %v1440_v50  ;;  %v1457_v30 = vmul.f32 0.8333333, %v1425_v23  ;;  %v1051_v2 = vadd.f32 %v1011_v40, %v931_v51  ;;  %v1202_v32 = vmul.f32 %v1166_v53, %v2898_v28 }
 0x1c4   :  { %v1090_v3 = vmul.f32 2.5, %v1050_v55  ;;  %v1203_v10 = vmul.f32 %v1167_v46, %v2903_v63  ;;  %v1342_v43 = vsub.f32 1.6, %v2987_v49  ;;  %v1343_v7 = vsub.f32 1.6, %v2991_v58  ;;  %v3204_v55 = vld [vmem:[#allocation11_spill] sm:$0xff] }
 0x1c5   :  { %1496 = vmatpush.bf16.msra.mxu2 %v1470_v31  ;;  %v1478_v52 = vpack.c.bf16 %v1457_v30, %v1456_v44  ;;  %v1091_v35 = vmul.f32 2.5, %v1051_v2  ;;  %v1358_v11 = vsub.f32 1.6, %v3200_v0  ;;  %v1359_v28 = vsub.f32 1.6, %v3202_v21  ;;  %v3203_v44 = vld [vmem:[#allocation31_spill] sm:$0xff] }
 0x1c6   :  { %v1130_v5 = vmul.f32 %v2987_v49, %v1090_v3  ;;  %v1374_v26 = vmul.f32 %v1342_v43, %v2929_v61  ;;  %v3039_v63 = vadd.f32 2.2, %v2185_v6  ;;  %v1375_v34 = vmul.f32 %v1343_v7, %v2932_v62  ;;  %v3205_v31 = vld [vmem:[#allocation32_spill] sm:$0xff]  ;;  %v3206_v30 = vld [vmem:[#allocation13_spill] sm:$0xff] }
 0x1c7   :  { %1509 = vmatpush.bf16.msra.mxu3 %v1478_v52  ;;  %v1131_v27 = vmul.f32 %v2991_v58, %v1091_v35  ;;  %v1390_v13 = vmul.f32 %v1358_v11, %v2939_v60  ;;  %v3045_v29 = vadd.f32 2.2, %v2187_v8  ;;  %v1391_v17 = vmul.f32 %v1359_v28, %v2941_v18  ;;  %v580_v3 = vld [vmem:[#allocation5] sm:$0xf]  ;;  %v581_v35 = vld [vmem:[%s3092_s4] sm:$0xff]  ;;  %s1827_s4 = smov [#allocation7]  }
 0x1c8   :  { %v1238_v33 = vadd.f32 %v1202_v32, %v1130_v5  ;;  %vm708_vm7 = vcmp.ge.f32.partialorder %v3039_v63, 0.0  ;;  %vm752_vm3 = vcmp.lt.f32.partialorder %v3039_v63, 0.4  ;;  %v968_v60 = vsub.f32 0.8, %v3039_v63  ;;  %s1540_s11 = sshll.u32 %s1827_s4, 4  ;;  %s1541_s11 = int_to_ptr.vmem [resolvable:$true] %s1540_s11 }
 0x1c9   :  { %v1239_v61 = vadd.f32 %v1203_v10, %v1131_v27  ;;  %v1422_v6 = vadd.f32 %v1390_v13, %v1326_v15  ;;  %vm709_vm4 = vcmp.ge.f32.partialorder %v3045_v29, 0.0  ;;  %vm753_vm12 = vcmp.lt.f32.partialorder %v3045_v29, 0.4  ;;  %vm796_vm10 = vmand %vm708_vm7, %vm752_vm3 }
 0x1ca   :  { %v1274_v62 = vmul.f32 1.25, %v1238_v33  ;;  %v1423_v1 = vadd.f32 %v1391_v17, %v1327_v4  ;;  %vm797_vm13 = vmand %vm709_vm4, %vm753_vm12  ;;  %v1665_v8 = vsel %vm796_vm10, 1.0, %v3157_v22  ;;  %v969_v20 = vsub.f32 0.8, %v3045_v29 }
 0x1cb   :  { %v1275_v36 = vmul.f32 1.25, %v1239_v61  ;;  %v1454_v18 = vmul.f32 0.8333333, %v1422_v6  ;;  %v1666_v45 = vsel %vm797_vm13, 1.0, %v3157_v22  ;;  %v928_v14 = vmul.f32 %v1665_v8, %v3039_v63 }
 0x1cc   :  { %v1310_v53 = vmul.f32 %v2987_v49, %v1274_v62  ;;  %v1455_v19 = vmul.f32 0.8333333, %v1423_v1  ;;  %v929_v59 = vmul.f32 %v1666_v45, %v3045_v29  ;;  %v1008_v41 = vmul.f32 %v2944_v47, %v968_v60 }
 0x1cd   :  { %v1311_v57 = vmul.f32 %v2991_v58, %v1275_v36  ;;  %v1009_v16 = vmul.f32 %v2949_v48, %v969_v20  ;;  %v1164_v22 = vsub.f32 1.2, %v3039_v63  ;;  %v1165_v40 = vsub.f32 1.2, %v3045_v29 }
 0x1ce   :  { %v1406_v25 = vadd.f32 %v1374_v26, %v1310_v53  ;;  %v1477_v51 = vpack.c.bf16 %v1455_v19, %v1454_v18  ;;  %v1048_v12 = vadd.f32 %v1008_v41, %v928_v14  ;;  %v1324_v46 = vmul.f32 %v3204_v55, %v3203_v44 }
 0x1cf   :  { %v1407_v50 = vadd.f32 %v1375_v34, %v1311_v57  ;;  %v1049_v49 = vadd.f32 %v1009_v16, %v929_v59  ;;  %v1200_v47 = vmul.f32 %v1164_v22, %v2968_v42  ;;  %v1356_v0 = vsub.f32 1.6, %v3204_v55 }
 0x1d0   :  { %v1438_v23 = vmul.f32 0.8333333, %v1406_v25  ;;  %1510 = vmatpush.bf16.msra.mxu3 %v1477_v51  ;;  %v1088_v58 = vmul.f32 2.5, %v1048_v12  ;;  %v1201_v48 = vmul.f32 %v1165_v40, %v2970_v39  ;;  %v1325_v2 = vmul.f32 %v3206_v30, %v3205_v31 }
 0x1d1   :  { %v1439_v37 = vmul.f32 0.8333333, %v1407_v50  ;;  %v1089_v15 = vmul.f32 2.5, %v1049_v49  ;;  %v1357_v32 = vsub.f32 1.6, %v3206_v30  ;;  %v1388_v7 = vmul.f32 %v1356_v0, %v3001_v38 }
 0x1d2   :  { %v1128_v43 = vmul.f32 %v3039_v63, %v1088_v58  ;;  %vm1517_vm14 = vcmask 261120   ;;  %v1340_v24 = vsub.f32 1.6, %v3039_v63  ;;  %v1341_v11 = vsub.f32 1.6, %v3045_v29 }
 0x1d3   :  { %v1469_v10 = vpack.c.bf16 %v1439_v37, %v1438_v23  ;;  %v1129_v52 = vmul.f32 %v3045_v29, %v1089_v15  ;;  %v1389_v42 = vmul.f32 %v1357_v32, %v3010_v54  ;;  %v1420_v21 = vadd.f32 %v1388_v7, %v1324_v46  ;;  %1709 = vmatmul.msk.bf16.vlgmr.msrb.gmra.mxu1 %vm1517_vm14, %v580_v3 }
 0x1d4   :  { %v1236_v39 = vadd.f32 %v1200_v47, %v1128_v43  ;;  %v1372_v26 = vmul.f32 %v1340_v24, %v2996_v56  ;;  %v1486_v28 = vunpack.c.h.b16 %v581_v35  ;;  %v1373_v27 = vmul.f32 %v1341_v11, %v2998_v9 }
 0x1d5   :  { %1497 = vmatpush.bf16.msra.mxu2 %v1469_v10  ;;  %v1237_v4 = vadd.f32 %v1201_v48, %v1129_v52  ;;  %v1421_v5 = vadd.f32 %v1389_v42, %v1325_v2  ;;  %v1452_v34 = vmul.f32 0.8333333, %v1420_v21  ;;  %v1485_v8 = vunpack.c.l.b16 %v581_v35 }
 0x1d6   :  { %v1272_v38 = vmul.f32 1.25, %v1236_v39  ;;  %v1488_v62 = vpack.c.b16 %v1486_v28, %v1486_v28 }
 0x1d7   :  { %v1273_v54 = vmul.f32 1.25, %v1237_v4  ;;  %v1453_v13 = vmul.f32 0.8333333, %v1421_v5  ;;  %v1487_v18 = vpack.c.b16 %v1485_v8, %v1485_v8 }
 0x1d8   :  { %v1308_v33 = vmul.f32 %v3039_v63, %v1272_v38 }
 0x1d9   :  { %v1309_v17 = vmul.f32 %v3045_v29, %v1273_v54  ;;  %v1476_v61 = vpack.c.bf16 %v1453_v13, %v1452_v34 }
 0x1da   :  { %v1404_v6 = vadd.f32 %v1372_v26, %v1308_v33 }
 0x1db   :  { %v1405_v1 = vadd.f32 %v1373_v27, %v1309_v17  ;;  %1511 = vmatpush.bf16.msra.mxu3 %v1476_v61 }
 0x1dc   :  { %v1436_v60 = vmul.f32 0.8333333, %v1404_v6 }
 0x1dd   :  { %v1437_v36 = vmul.f32 0.8333333, %v1405_v1 }
 0x1de   :  { %1512 = vmatmul.bf16.vlgmr.msra.gmra.mxu3 %v1488_v62 }
 0x1df   :  { %v1468_v56 = vpack.c.bf16 %v1437_v36, %v1436_v60 }
 0x1e1   :  { %1498 = vmatpush.bf16.msra.mxu2 %v1468_v56 }
 0x1e4   :  { %1499 = vmatmul.bf16.vlgmr.msra.gmra.mxu2 %v1487_v18 }
 0x250   :  { %v1530_v9 = vpop.f32.mrf.mxu1 }
 0x258   :  { %v1532_v45 = vpop.f32.mrf.mxu1 }
 0x261   :  { %v1513_v14 = vpop.f32.mrf.mxu3 }
 0x267   :  { %v1500_v53 = vpop.f32.mrf.mxu2 }
 0x268   :  { %v1514_v63 = vadd.f32 %v1513_v14, %v1500_v53 }
 0x269   :  { %v1515_v29 = vpop.f32.mrf.mxu3 }
 0x26a   :  { %v1531_v19 = vadd.f32 %v1530_v9, %v1514_v63 }
 0x26c   :  { %1534 = vst [vmem:[#allocation7] sm:$0xff] %v1531_v19 }
 0x26d   :  { %1545 = dma.vmem_to_hbm [thread:$0]  %s1541_s11, 128, %s1543_s14, [#allocation4]  }
 0x26f   :  { %v1502_v59 = vpop.f32.mrf.mxu2 }
 0x270   :  { %1820 = dma.done.wait [#allocation4], 128  }
 0x271   :  { %1821 = vsyncadd [#allocation4], 4294967168 }
 0x272   :  { %1550 = vsyncpa [#allocation3], 1 }
 0x273   :  { %1551 = vsyncpa [#allocation6], 1 }
 0x274   :  { %1552 = vsyncpa [#allocation4], 1 }

</bundles_post_ra>
